<compile_context>
chip_gen: v5e
topology: v5e:2x2
jax: 0.10.0
libtpu: 0.0.40
codegen_flags: <defaults>
</compile_context>

<pallas_src>
import jax
import jax.numpy as jnp
from jax.experimental import pallas as pl
from jax.experimental.pallas import tpu as pltpu


def _round_up(n: int, m: int) -> int:
    return ((n + m - 1) // m) * m


def _autoencoder_kernel(x_ref, w1_ref, b1_ref, w2_ref, b2_ref, hid_ref, out_ref):
    # Encoder (fc1) runs once; its output block is grid-invariant and stays
    # resident in VMEM, so later chunks just re-read it.
    @pl.when(pl.program_id(0) == 0)
    def _():
        hid_ref[...] = jnp.dot(x_ref[...], w1_ref[...],
                               preferred_element_type=jnp.float32) + b1_ref[...]

    # Decoder (fc4) on this chunk of output columns + softmax over axis=0
    # (batch axis) -- the full batch is in this block, so softmax is exact
    # per column chunk.
    h = hid_ref[...].astype(w2_ref.dtype)                                # (B, Hp) bf16
    logits = jnp.dot(h, w2_ref[...],
                     preferred_element_type=jnp.float32) + b2_ref[...]   # (B, Dc) f32
    m = jnp.max(logits, axis=0, keepdims=True)
    e = jnp.exp(logits - m)
    s = jnp.sum(e, axis=0, keepdims=True)
    out_ref[...] = e * pl.reciprocal(s, approx=False)                    # exact norm


def make_autoencoder_forward(fc1_w, fc1_b, fc4_w, fc4_b, n_chunks: int = 2):
    """Prepare padded bf16 weights ONCE and return a jitted forward(x).

    fc1_w: (300, org)  fc1_b: (300,)  fc4_w: (org, 300)  fc4_b: (org,)
    forward(x) with x (B, org) f32 returns (hidden (B,300) f32, out (B,org) f32).
    """
    hid, din = fc1_w.shape
    dout = fc4_w.shape[0]

    n_chunks = max(1, min(n_chunks, -(-dout // 128)))
    din_p = _round_up(din, 128)
    hid_p = _round_up(hid, 128)
    dout_c = _round_up(-(-dout // n_chunks), 128)   # per-chunk columns (lane dense)
    dout_p = dout_c * n_chunks

    # One-time weight prep (transpose to (in, out), zero-pad, bf16 cast).
    w1 = jnp.zeros((din_p, hid_p), jnp.bfloat16).at[:din, :hid].set(
        jnp.asarray(fc1_w).T.astype(jnp.bfloat16))
    b1 = jnp.zeros((1, hid_p), jnp.float32).at[0, :hid].set(
        jnp.asarray(fc1_b, dtype=jnp.float32))
    w2 = jnp.zeros((hid_p, dout_p), jnp.bfloat16).at[:hid, :dout].set(
        jnp.asarray(fc4_w).T.astype(jnp.bfloat16))
    b2 = jnp.zeros((1, dout_p), jnp.float32).at[0, :dout].set(
        jnp.asarray(fc4_b, dtype=jnp.float32))

    @jax.jit
    def forward(x):
        B = x.shape[0]
        # Input pad / bf16 cast fuses into this jit (no extra HBM round-trip).
        xp = jnp.zeros((B, din_p), jnp.bfloat16).at[:, :din].set(
            x.astype(jnp.bfloat16))

        flops = 2 * B * din_p * hid_p + 2 * B * hid_p * dout_p
        transcendentals = B * dout_p + dout_p
        bytes_accessed = (B * din_p * 2 + din_p * hid_p * 2 + hid_p * dout_p * 2
                          + hid_p * 4 + dout_p * 4
                          + B * hid_p * 4 + B * dout_p * 4)

        hid_pad, out_pad = pl.pallas_call(
            _autoencoder_kernel,
            out_shape=(jax.ShapeDtypeStruct((B, hid_p), jnp.float32),
                       jax.ShapeDtypeStruct((B, dout_p), jnp.float32)),
            grid=(n_chunks,),
            in_specs=[
                pl.BlockSpec((B, din_p), lambda j: (0, 0)),       # x      (invariant)
                pl.BlockSpec((din_p, hid_p), lambda j: (0, 0)),   # w1     (invariant)
                pl.BlockSpec((1, hid_p), lambda j: (0, 0)),       # b1     (invariant)
                pl.BlockSpec((hid_p, dout_c), lambda j: (0, j)),  # w2     (streamed)
                pl.BlockSpec((1, dout_c), lambda j: (0, j)),      # b2     (streamed)
            ],
            out_specs=(
                pl.BlockSpec((B, hid_p), lambda j: (0, 0)),       # hidden (invariant)
                pl.BlockSpec((B, dout_c), lambda j: (0, j)),      # out    (streamed)
            ),
            compiler_params=pltpu.CompilerParams(
                dimension_semantics=("arbitrary",)),
            cost_estimate=pl.CostEstimate(
                flops=flops,
                transcendentals=transcendentals,
                bytes_accessed=bytes_accessed),
        )(xp, w1, b1, w2, b2)

        # Un-pad (fuses into the jit). Padded softmax columns are independent
        # of the valid ones (softmax is per-column over axis=0), so exact.
        return hid_pad[:, :hid], out_pad[:, :dout]

    return forward


def reference_bf16_path(x, fc1_w, fc1_b, fc4_w, fc4_b):
    """Reference matching the kernel's bf16-operand / f32-accumulate math."""
    f32 = jnp.float32
    xb = x.astype(jnp.bfloat16).astype(f32)
    w1 = fc1_w.T.astype(jnp.bfloat16).astype(f32)
    w2 = fc4_w.T.astype(jnp.bfloat16).astype(f32)
    h = xb @ w1 + fc1_b[None, :]
    hb = h.astype(jnp.bfloat16).astype(f32)
    logits = hb @ w2 + fc4_b[None, :]
    return h, jax.nn.softmax(logits, axis=0)


def reference_f32(x, fc1_w, fc1_b, fc4_w, fc4_b):
    """Pure f32 reference matching the PyTorch module exactly."""
    h = x @ fc1_w.T + fc1_b[None, :]
    logits = h @ fc4_w.T + fc4_b[None, :]
    return h, jax.nn.softmax(logits, axis=0)


if __name__ == "__main__":
    # org_size = 881 as in the module source; hidden = 300 fixed by the module.
    B, ORG, HID = 8, 881, 300

    key = jax.random.PRNGKey(0)
    kx, kw1, kb1, kw2, kb2 = jax.random.split(key, 5)

    x = jax.random.normal(kx, (B, ORG), dtype=jnp.float32)
    fc1_w = jax.random.normal(kw1, (HID, ORG), dtype=jnp.float32) * 0.03
    fc1_b = jax.random.normal(kb1, (HID,), dtype=jnp.float32) * 0.01
    fc4_w = jax.random.normal(kw2, (ORG, HID), dtype=jnp.float32) * 0.03
    fc4_b = jax.random.normal(kb2, (ORG,), dtype=jnp.float32) * 0.01

    # Weight prep happens once here, outside the per-call path.
    forward = make_autoencoder_forward(fc1_w, fc1_b, fc4_w, fc4_b, n_chunks=2)

    hidden, out = forward(x)
    hidden = jax.block_until_ready(hidden)
    out = jax.block_until_ready(out)

    hid_ref, out_ref = reference_bf16_path(x, fc1_w, fc1_b, fc4_w, fc4_b)
    hid_f32, out_f32 = reference_f32(x, fc1_w, fc1_b, fc4_w, fc4_b)

    assert hidden.shape == (B, HID) and out.shape == (B, ORG)
    # Tight: kernel vs the same bf16-operand / f32-accumulate math.
    assert jnp.allclose(hidden, hid_ref, atol=2e-3, rtol=2e-3)
    assert jnp.allclose(out, out_ref, atol=5e-3, rtol=5e-3)
    # Loose: kernel vs pure-f32 module semantics (bf16 rounding only).
    assert jnp.allclose(hidden, hid_f32, atol=5e-2, rtol=5e-2)
    assert jnp.allclose(out, out_f32, atol=5e-2, rtol=5e-2)
    # softmax over axis=0 => each valid column sums to 1 (exact reciprocal now)
    assert jnp.allclose(jnp.sum(out, axis=0), jnp.ones((ORG,)), atol=1e-3)

    print("KERNEL_OK")
</pallas_src>

<mosaic_0001>
module attributes {stable_mosaic.version = 11 : i64} {
  func.func @_autoencoder_kernel(%arg0: i32, %arg1: memref<8x896xbf16, #tpu.memory_space<vmem>>, %arg2: memref<896x384xbf16, #tpu.memory_space<vmem>>, %arg3: memref<1x384xf32, #tpu.memory_space<vmem>>, %arg4: memref<384x512xbf16, #tpu.memory_space<vmem>>, %arg5: memref<1x512xf32, #tpu.memory_space<vmem>>, %arg6: memref<8x384xf32, #tpu.memory_space<vmem>>, %arg7: memref<8x512xf32, #tpu.memory_space<vmem>>) attributes {dimension_semantics = [#tpu.dimension_semantics<arbitrary>], iteration_bounds = array<i64: 2>, scalar_prefetch = 0 : i64, scratch_operands = 0 : i64, tpu.core_type = #tpu.core_type<tc>, window_params = [{pipeline_mode = #tpu.pipeline_mode<synchronous>, transform_indices = @transform_0, window_bounds = array<i64: 8, 896>}, {pipeline_mode = #tpu.pipeline_mode<synchronous>, transform_indices = @transform_1, window_bounds = array<i64: 896, 384>}, {pipeline_mode = #tpu.pipeline_mode<synchronous>, transform_indices = @transform_2, window_bounds = array<i64: 1, 384>}, {transform_indices = @transform_3, window_bounds = array<i64: 384, 512>}, {transform_indices = @transform_4, window_bounds = array<i64: 1, 512>}, {pipeline_mode = #tpu.pipeline_mode<synchronous>, transform_indices = @transform_5, window_bounds = array<i64: 8, 384>}, {transform_indices = @transform_6, window_bounds = array<i64: 8, 512>}]} {
    %c0_i32 = arith.constant 0 : i32
    %0 = arith.cmpi eq, %arg0, %c0_i32 : i32
    %1 = arith.extui %0 : i1 to i32
    %c0_i32_0 = arith.constant 0 : i32
    %2 = arith.cmpi ne, %1, %c0_i32_0 : i32
    scf.if %2 {
      %c0_10 = arith.constant 0 : index
      %c0_11 = arith.constant 0 : index
      %21 = vector.load %arg1[%c0_10, %c0_11] : memref<8x896xbf16, #tpu.memory_space<vmem>>, vector<8x896xbf16>
      %c0_12 = arith.constant 0 : index
      %c0_13 = arith.constant 0 : index
      %22 = vector.load %arg2[%c0_12, %c0_13] : memref<896x384xbf16, #tpu.memory_space<vmem>>, vector<896x384xbf16>
      %cst_14 = arith.constant dense<0.000000e+00> : vector<8x384xf32>
      %23 = tpu.matmul %21, %22, %cst_14 {dimension_numbers = #tpu.dot_dimension_numbers<[1], [0], [0], [1], [0, 0, 1, 1], [], []>} : vector<8x896xbf16>, vector<896x384xbf16>, vector<8x384xf32> -> vector<8x384xf32>
      %c0_15 = arith.constant 0 : index
      %c0_16 = arith.constant 0 : index
      %24 = vector.load %arg3[%c0_15, %c0_16] : memref<1x384xf32, #tpu.memory_space<vmem>>, vector<1x384xf32>
      %25 = vector.broadcast %24 : vector<1x384xf32> to vector<8x384xf32>
      %26 = arith.addf %23, %25 : vector<8x384xf32>
      %c0_17 = arith.constant 0 : index
      %c0_18 = arith.constant 0 : index
      %27 = vector.load %arg6[%c0_17, %c0_18] : memref<8x384xf32, #tpu.memory_space<vmem>>, vector<8x384xf32>
      tpu.vector_store %arg6[%c0_17, %c0_18], %26 {strides = array<i32>} : memref<8x384xf32, #tpu.memory_space<vmem>>, vector<8x384xf32>,
    } else {
    }
    %c0 = arith.constant 0 : index
    %c0_1 = arith.constant 0 : index
    %3 = vector.load %arg6[%c0, %c0_1] : memref<8x384xf32, #tpu.memory_space<vmem>>, vector<8x384xf32>
    %4 = arith.truncf %3 : vector<8x384xf32> to vector<8x384xbf16>
    %c0_2 = arith.constant 0 : index
    %c0_3 = arith.constant 0 : index
    %5 = vector.load %arg4[%c0_2, %c0_3] : memref<384x512xbf16, #tpu.memory_space<vmem>>, vector<384x512xbf16>
    %cst = arith.constant dense<0.000000e+00> : vector<8x512xf32>
    %6 = tpu.matmul %4, %5, %cst {dimension_numbers = #tpu.dot_dimension_numbers<[1], [0], [0], [1], [0, 0, 1, 1], [], []>} : vector<8x384xbf16>, vector<384x512xbf16>, vector<8x512xf32> -> vector<8x512xf32>
    %c0_4 = arith.constant 0 : index
    %c0_5 = arith.constant 0 : index
    %7 = vector.load %arg5[%c0_4, %c0_5] : memref<1x512xf32, #tpu.memory_space<vmem>>, vector<1x512xf32>
    %8 = vector.broadcast %7 : vector<1x512xf32> to vector<8x512xf32>
    %9 = arith.addf %6, %8 : vector<8x512xf32>
    %cst_6 = arith.constant dense<0xFF800000> : vector<512xf32>
    %10 = vector.multi_reduction <maximumf>, %9, %cst_6 [0] : vector<8x512xf32> to vector<512xf32>
    %11 = vector.shape_cast %10 : vector<512xf32> to vector<1x512xf32>
    %12 = vector.broadcast %11 : vector<1x512xf32> to vector<8x512xf32>
    %13 = arith.subf %9, %12 : vector<8x512xf32>
    %14 = math.exp %13 : vector<8x512xf32>
    %cst_7 = arith.constant dense<0.000000e+00> : vector<512xf32>
    %15 = vector.multi_reduction <add>, %14, %cst_7 [0] : vector<8x512xf32> to vector<512xf32>
    %16 = vector.shape_cast %15 : vector<512xf32> to vector<1x512xf32>
    %17 = tpu.reciprocal %16 : vector<1x512xf32> -> vector<1x512xf32>
    %18 = vector.broadcast %17 : vector<1x512xf32> to vector<8x512xf32>
    %19 = arith.mulf %14, %18 : vector<8x512xf32>
    %c0_8 = arith.constant 0 : index
    %c0_9 = arith.constant 0 : index
    %20 = vector.load %arg7[%c0_8, %c0_9] : memref<8x512xf32, #tpu.memory_space<vmem>>, vector<8x512xf32>
    tpu.vector_store %arg7[%c0_8, %c0_9], %19 {strides = array<i32>} : memref<8x512xf32, #tpu.memory_space<vmem>>, vector<8x512xf32>,
    return
  }
  func.func @transform_0(%arg0: i32) -> (i32, i32) {
    %c0_i32 = arith.constant 0 : i32
    %c0_i32_0 = arith.constant 0 : i32
    %c0_i32_1 = arith.constant 0 : i32
    return %c0_i32, %c0_i32_0 : i32, i32
  }
  func.func @transform_1(%arg0: i32) -> (i32, i32) {
    %c0_i32 = arith.constant 0 : i32
    %c0_i32_0 = arith.constant 0 : i32
    %c0_i32_1 = arith.constant 0 : i32
    return %c0_i32, %c0_i32_0 : i32, i32
  }
  func.func @transform_2(%arg0: i32) -> (i32, i32) {
    %c0_i32 = arith.constant 0 : i32
    %c0_i32_0 = arith.constant 0 : i32
    %c0_i32_1 = arith.constant 0 : i32
    return %c0_i32, %c0_i32_0 : i32, i32
  }
  func.func @transform_3(%arg0: i32) -> (i32, i32) {
    %c0_i32 = arith.constant 0 : i32
    %c0_i32_0 = arith.constant 0 : i32
    return %c0_i32, %arg0 : i32, i32
  }
  func.func @transform_4(%arg0: i32) -> (i32, i32) {
    %c0_i32 = arith.constant 0 : i32
    %c0_i32_0 = arith.constant 0 : i32
    return %c0_i32, %arg0 : i32, i32
  }
  func.func @transform_5(%arg0: i32) -> (i32, i32) {
    %c0_i32 = arith.constant 0 : i32
    %c0_i32_0 = arith.constant 0 : i32
    %c0_i32_1 = arith.constant 0 : i32
    return %c0_i32, %c0_i32_0 : i32, i32
  }
  func.func @transform_6(%arg0: i32) -> (i32, i32) {
    %c0_i32 = arith.constant 0 : i32
    %c0_i32_0 = arith.constant 0 : i32
    return %c0_i32, %arg0 : i32, i32
  }
}

</mosaic_0001>

<bundles_post_ra>
// kernel: forward.1
= control target key start
LH: loop header
LB: loop body
LE: loop exit
PB: predicated region body
PF: predicated region fallthrough
CT: control target
= control target key end

     0   :  { %12 = vsyncpa [#allocation3], 0  ;;  %s4732_s0 = inlined_call_operand.vmem [shape: bf16[8,896], index: 0, kind: input, shape index: {}]   ;;  %s4733_s1 = inlined_call_operand.hbm [shape: bf16[896,384], index: 1, kind: input, shape index: {}]   ;;  %s4734_s2 = inlined_call_operand.vmem [shape: f32[1,384], index: 2, kind: input, shape index: {}]   ;;  %s4735_s3 = inlined_call_operand.hbm [shape: bf16[384,1024], index: 3, kind: input, shape index: {}]   ;;  %s4736_s4 = inlined_call_operand.vmem [shape: f32[1,1024], index: 4, kind: input, shape index: {}]   ;;  %s4737_s5 = inlined_call_operand.hbm [shape: f32[8,384], index: 5, kind: output, shape index: {0}]   ;;  %s4738_s6 = inlined_call_operand.vmem [shape: f32[8,1024], index: 6, kind: output, shape index: {1}]  }
   0x1   :  { %13 = vsyncpa [#allocation6], 0 }
   0x2   :  { %15 = vsyncpa [#allocation6 + $0x1], 0 }
   0x3   :  { %16 = vsyncpa [#allocation4], 0  ;;  %s4326_s21 = smov 0   ;;  %s4328_s22 = smov 0  }
   0x4   :  { %s4330_s23 = smov 0   ;;  %s4332_s24 = smov 0  }
   0x5 LB: > { %s4345_s25 = sadd.s32 4294967295, %s4282_s24   ;;  %p105_p0 = scmp.ne.s32.totalorder %s4274_s22, %s4270_s21  ;;  %s4282_s24 = sphi %s4332_s24, %s4745_s24   ;;  %s4278_s23 = sphi %s4330_s23, %s4744_s23   ;;  %s4274_s22 = sphi %s4328_s22, %s4743_s22   ;;  %s4270_s21 = sphi %s4326_s21, %s4742_s21  }
   0x6   : > { %p106_p1 = scmp.eq.s32.totalorder %s4345_s25, 0  ;;  %p2736_p2 = scmp.ge.s32.totalorder %s4282_s24, 1 }
   0x7   : > { %p189_p3 = scmp.lt.s32.totalorder %s4282_s24, 3  ;;  %p2737_p4 = scmp.ne.s32.totalorder %s4345_s25, 0 }
   0x8   : > { %p4354_p5 = por %p106_p1, %p105_p0  ;;  %s203_s29 = sshll.u32 %s4733_s1, 4  ;;  %s204_s29 = int_to_ptr.hbm [resolvable:$true] %s203_s29 }
   0x9   : > { %p4361_p6 = pnand %p2736_p2, %p189_p3  ;;  %s4284_s7 = smov [#allocation2]  }
   0xa   : > { %s205_s8 = sshll.u32 %s4284_s7, 4  ;;  %s4370_s9 = sadd.s32 1, %s4282_s24   ;;  %s206_s8 = int_to_ptr.vmem [resolvable:$true] %s205_s8 }
   0xb   : > { %p4084_p7 = pneg %p4361_p6  ;;  %s4285_s10 = smov 192  }
   0xc   : > { %s4286_s11 = smov 12   ;;  %s89_s12 = ssub.s32 %s4282_s24, %s4370_s9 }
   0xd   : > { %p4085_p8 = pnand %p4084_p7, %p106_p1  ;;  %s92_s13 = sadd.s32 1, %s4278_s23 }
   0xe   : > { %p90_p9 = scmp.eq.s32.totalorder %s89_s12, 0  ;;  %p99_p10 = scmp.ne.s32.totalorder %s4278_s23, %s4274_s22 }
   0xf   : > { %4087 = dma.hbm_to_vmem [thread:$0]  (!%p4085_p8), %s204_s29, 21504, %s206_s8, [#allocation3], %s4285_s10, %s4285_s10, %s4286_s11  }
  0x10   : > { %p100_p11 = scmp.eq.s32.totalorder %s4282_s24, 0  ;;  %p4093_p12 = scmp.lt.s32.totalorder %s4282_s24, 2 }
  0x11   : > { %s4380_s14 = scalar_select %p90_p9, %s4278_s23, %s92_s13  }
  0x12   : > { %p101_p13 = por %p100_p11, %p99_p10  ;;  %s222_s15 = sand.u32 1, %s4278_s23  }
  0x13   : > { %s4072_s16 = smul.u32 768, %s222_s15  ;;  %s3807_s17 = sshll.u32 %s4282_s24, 4 }
  0x14   : > { %p4384_p0 = pnand %p4093_p12, %p101_p13  ;;  %s231_s21 = scalar_lea.hbm %s4735_s3, %s3807_s17 }
  0x15   : > { %s232_s27 = sshll.u32 %s231_s21, 4  ;;  %s226_s28 = scalar_lea.vmem [#allocation5], %s4072_s16  ;;  %s233_s27 = int_to_ptr.hbm [resolvable:$true] %s232_s27 }
  0x16   : > { %s234_s29 = sshll.u32 %s226_s28, 4  ;;  %s223_s7 = scalar_lea.sflag [#allocation6], %s222_s15  ;;  %s235_s29 = int_to_ptr.vmem [resolvable:$true] %s234_s29 }
  0x17   : > { %s4182_s8 = sshra.s32 %s233_s27, 4  ;;  %p4186_p3 = pneg %p4384_p0  ;;  %s4183_s8 = int_to_ptr.hbm [resolvable:$true] %s4182_s8 }
  0x18   : > { %s4184_s10 = scalar_lea.hbm %s4183_s8, 768  ;;  %s4189_s12 = scalar_lea.hbm %s4735_s3, 1536 }
  0x19   : > { %p4185_p2 = scmp.ne.s32.totalorder %s4183_s8, %s4184_s10  ;;  %p4190_p9 = scmp.lt.s32.totalorder %s4183_s8, %s4735_s3 }
  0x1a   : > { %p4191_p10 = scmp.lt.s32.totalorder %s4189_s12, %s4184_s10 }
  0x1b   : > { %p4187_p7 = pnand %p4186_p3, %p4185_p2 }
  0x1c   : > { %p4192_p11 = por %p4191_p10, %p4190_p9 }
  0x1d   : > { %p4188_p8 = pneg %p4187_p7 }
  0x1f   : > { %p4193_p12 = pnand %p4192_p11, %p4188_p8 }
  0x21   : > { %4196 = shalt.err (!%p4193_p12)
}
  0x22   : > { %s4287_s15 = smov 512   ;;  %s4288_s16 = smov 256  }
  0x23   : > { %s4289_s19 = smov 16   ;;  %254 = sbr.rel (%p4361_p6) target bundleno = 673 (0x2a1), region = 40 }
  0x24   : > { %4091 = dma.hbm_to_vmem [thread:$0]  (!%p4384_p0), %s233_s27, 12288, %s235_s29, %s223_s7, %s4287_s15, %s4288_s16, %s4289_s19  }
  0x28   : > { %4257 = dma.done.wait (%p106_p1), [#allocation3], 21504  }
  0x29   : > { %4259 = vsyncadd (%p106_p1), [#allocation3], 4294945792  ;;  %s261_s20 = sand.u32 1, %s4274_s22  }
  0x2a   : > { %s4073_s21 = smul.u32 768, %s261_s20  ;;  %s262_s28 = scalar_lea.sflag [#allocation6], %s261_s20 }
  0x2c   : > { %s4408_s8 = scalar_lea.vmem [#allocation5], %s4073_s21 }
  0x2d   : > { %4261 = dma.done.wait (%p4354_p5), %s262_s28, 12288  }
  0x2e   : > { %4263 = vsyncadd (%p4354_p5), %s262_s28, 4294955008  ;;  %s2743_s30 = sshll.u32 %s4345_s25, 2 }
  0x2f   : > { %p301_p6 = scmp.lt.s32.totalorder %s2743_s30, 7  ;;  %314 = sbr.rel (%p2737_p4) target bundleno = 380 (0x17c), region = 52 }
  0x31   : > { %s4747_s30 = smov (!%p301_p6, %s2743_s30), 7 }
  0x32   : > { %s303_s29 = scalar_lea.vmem %s4736_s4, %s4747_s30  ;;  %s2745_s7 = sshll.u32 %s4747_s30, 3 }
  0x33   : > { %s4425_s11 = scalar_lea.vmem %s4738_s6, %s2745_s7 }
  0x34   : > { %v2833_v0 = vld [vmem:[#allocation2 + $0xa8] sm:$0xf]  ;;  %v3830_v1 = vld [vmem:[#allocation2 + $0xb0] sm:$0xf0]  ;;  %v2821_v2 = vld [vmem:[#allocation2 + $0x90] sm:$0xf] }
  0x35   : > { %v2834_v3 = vor.u32 %v3830_v1, %v2833_v0  ;;  %v3827_v4 = vld [vmem:[#allocation2 + $0x98] sm:$0xf0]  ;;  %v3025_v5 = vld [vmem:[#allocation2 + $0x228] sm:$0xf]  ;;  %v3878_v6 = vld [vmem:[#allocation2 + $0x230] sm:$0xf0] }
  0x36   : > { %v3026_v7 = vor.u32 %v3878_v6, %v3025_v5  ;;  %v2929_v8 = vld [vmem:[#allocation2 + $0x168] sm:$0xf]  ;;  %v2822_v9 = vor.u32 %v3827_v4, %v2821_v2  ;;  %v3854_v10 = vld [vmem:[#allocation2 + $0x170] sm:$0xf0]  ;;  %v3013_v11 = vld [vmem:[#allocation2 + $0x210] sm:$0xf] }
  0x37   : > { %1472 = vmatpush.bf16.msra.mxu0 %v2834_v3  ;;  %v3875_v12 = vld [vmem:[#allocation2 + $0x218] sm:$0xf0]  ;;  %v2809_v13 = vld [vmem:[#allocation2 + $0x78] sm:$0xf]  ;;  %v3824_v14 = vld [vmem:[#allocation2 + $0x80] sm:$0xf0]  ;;  %v2930_v15 = vor.u32 %v3854_v10, %v2929_v8 }
  0x38   : > { %1498 = vmatpush.bf16.msra.mxu2 %v3026_v7  ;;  %v3014_v16 = vor.u32 %v3875_v12, %v3013_v11  ;;  %v2917_v17 = vld [vmem:[#allocation2 + $0x150] sm:$0xf]  ;;  %v3851_v18 = vld [vmem:[#allocation2 + $0x158] sm:$0xf0]  ;;  %v3001_v19 = vld [vmem:[#allocation2 + $0x1f8] sm:$0xf]  ;;  %v2810_v24 = vor.u32 %v3824_v14, %v2809_v13 }
  0x39   : > { %v3872_v20 = vld [vmem:[#allocation2 + $0x200] sm:$0xf0]  ;;  %1485 = vmatpush.bf16.msra.mxu1 %v2930_v15  ;;  %v2918_v21 = vor.u32 %v3851_v18, %v2917_v17  ;;  %v3121_v22 = vld [vmem:[#allocation2 + $0x2e8] sm:$0xf]  ;;  %v3902_v23 = vld [vmem:[#allocation2 + $0x2f0] sm:$0xf0] }
  0x3a   : > { %v3122_v25 = vor.u32 %v3902_v23, %v3121_v22  ;;  %v2905_v26 = vld [vmem:[#allocation2 + $0x138] sm:$0xf]  ;;  %v3848_v27 = vld [vmem:[#allocation2 + $0x140] sm:$0xf0]  ;;  %v2797_v28 = vld [vmem:[#allocation2 + $0x60] sm:$0xf]  ;;  %v3002_v30 = vor.u32 %v3872_v20, %v3001_v19 }
  0x3b   : > { %1473 = vmatpush.bf16.msra.mxu0 %v2822_v9  ;;  %v3821_v29 = vld [vmem:[#allocation2 + $0x68] sm:$0xf0]  ;;  %v3109_v31 = vld [vmem:[#allocation2 + $0x2d0] sm:$0xf]  ;;  %v2989_v32 = vld [vmem:[#allocation2 + $0x1e0] sm:$0xf]  ;;  %v2906_v35 = vor.u32 %v3848_v27, %v2905_v26 }
  0x3c   : > { %1499 = vmatpush.bf16.msra.mxu2 %v3014_v16  ;;  %1511 = vmatpush.bf16.msra.mxu3 %v3122_v25  ;;  %v3869_v33 = vld [vmem:[#allocation2 + $0x1e8] sm:$0xf0]  ;;  %v3899_v34 = vld [vmem:[#allocation2 + $0x2d8] sm:$0xf0]  ;;  %v2893_v37 = vld [vmem:[#allocation2 + $0x120] sm:$0xf]  ;;  %v2798_v38 = vor.u32 %v3821_v29, %v2797_v28 }
  0x3d   : > { %1486 = vmatpush.bf16.msra.mxu1 %v2918_v21  ;;  %v3110_v36 = vor.u32 %v3899_v34, %v3109_v31  ;;  %v3845_v39 = vld [vmem:[#allocation2 + $0x128] sm:$0xf0]  ;;  %v3097_v40 = vld [vmem:[#allocation2 + $0x2b8] sm:$0xf]  ;;  %v3896_v41 = vld [vmem:[#allocation2 + $0x2c0] sm:$0xf0]  ;;  %v2990_v44 = vor.u32 %v3869_v33, %v2989_v32 }
  0x3e   : > { %v2785_v42 = vld [vmem:[#allocation2 + $0x48] sm:$0xf]  ;;  %v3818_v43 = vld [vmem:[#allocation2 + $0x50] sm:$0xf0]  ;;  %v3098_v47 = vor.u32 %v3896_v41, %v3097_v40  ;;  %v2894_v48 = vor.u32 %v3845_v39, %v2893_v37  ;;  %v3085_v49 = vld [vmem:[#allocation2 + $0x2a0] sm:$0xf] }
  0x3f   : > { %1474 = vmatpush.bf16.msra.mxu0 %v2810_v24  ;;  %v2977_v45 = vld [vmem:[#allocation2 + $0x1c8] sm:$0xf]  ;;  %v3866_v46 = vld [vmem:[#allocation2 + $0x1d0] sm:$0xf0]  ;;  %v3893_v50 = vld [vmem:[#allocation2 + $0x2a8] sm:$0xf0]  ;;  %v2786_v51 = vor.u32 %v3818_v43, %v2785_v42 }
  0x40   : > { %1500 = vmatpush.bf16.msra.mxu2 %v3002_v30  ;;  %1512 = vmatpush.bf16.msra.mxu3 %v3110_v36  ;;  %v2881_v52 = vld [vmem:[#allocation2 + $0x108] sm:$0xf]  ;;  %v3842_v53 = vld [vmem:[#allocation2 + $0x110] sm:$0xf0]  ;;  %v2773_v54 = vld [vmem:[#allocation2 + $0x30] sm:$0xf]  ;;  %v2978_v56 = vor.u32 %v3866_v46, %v2977_v45  ;;  %v3086_v59 = vor.u32 %v3893_v50, %v3085_v49 }
  0x41   : > { %1487 = vmatpush.bf16.msra.mxu1 %v2906_v35  ;;  %v3815_v55 = vld [vmem:[#allocation2 + $0x38] sm:$0xf0]  ;;  %v2965_v57 = vld [vmem:[#allocation2 + $0x1b0] sm:$0xf]  ;;  %v2882_v60 = vor.u32 %v3842_v53, %v2881_v52  ;;  %v3073_v61 = vld [vmem:[#allocation2 + $0x288] sm:$0xf] }
  0x42   : > { %v3863_v58 = vld [vmem:[#allocation2 + $0x1b8] sm:$0xf0]  ;;  %v3890_v62 = vld [vmem:[#allocation2 + $0x290] sm:$0xf0]  ;;  %v2774_v63 = vor.u32 %v3815_v55, %v2773_v54  ;;  %v2869_v0 = vld [vmem:[#allocation2 + $0xf0] sm:$0xf] }
  0x43   : > { %1475 = vmatpush.bf16.msra.mxu0 %v2798_v38  ;;  %v3839_v1 = vld [vmem:[#allocation2 + $0xf8] sm:$0xf0]  ;;  %v2761_v2 = vld [vmem:[#allocation2 + $0x18] sm:$0xf]  ;;  %v3812_v3 = vld [vmem:[#allocation2 + $0x20] sm:$0xf0]  ;;  %v2966_v4 = vor.u32 %v3863_v58, %v2965_v57  ;;  %v3074_v7 = vor.u32 %v3890_v62, %v3073_v61 }
  0x44   : > { %1501 = vmatpush.bf16.msra.mxu2 %v2990_v44  ;;  %1513 = vmatpush.bf16.msra.mxu3 %v3098_v47  ;;  %v2953_v5 = vld [vmem:[#allocation2 + $0x198] sm:$0xf]  ;;  %v3860_v6 = vld [vmem:[#allocation2 + $0x1a0] sm:$0xf0]  ;;  %v2870_v8 = vor.u32 %v3839_v1, %v2869_v0  ;;  %v3061_v9 = vld [vmem:[#allocation2 + $0x270] sm:$0xf]  ;;  %v2762_v11 = vor.u32 %v3812_v3, %v2761_v2 }
  0x45   : > { %1488 = vmatpush.bf16.msra.mxu1 %v2894_v48  ;;  %v3887_v10 = vld [vmem:[#allocation2 + $0x278] sm:$0xf0]  ;;  %v2749_v12 = vld [vmem:[#allocation2] sm:$0xf]  ;;  %v2857_v13 = vld [vmem:[#allocation2 + $0xd8] sm:$0xf]  ;;  %v2954_v16 = vor.u32 %v3860_v6, %v2953_v5 }
  0x46   : > { %v3836_v14 = vld [vmem:[#allocation2 + $0xe0] sm:$0xf0]  ;;  %v3809_v15 = vld [vmem:[#allocation2 + $0x8] sm:$0xf0]  ;;  %v3217_v17 = vld [vmem:[#allocation2 + $0x3a8] sm:$0xf]  ;;  %v3062_v21 = vor.u32 %v3887_v10, %v3061_v9 }
  0x47   : > { %1476 = vmatpush.bf16.msra.mxu0 %v2786_v51  ;;  %v3926_v18 = vld [vmem:[#allocation2 + $0x3b0] sm:$0xf0]  ;;  %v2941_v19 = vld [vmem:[#allocation2 + $0x180] sm:$0xf]  ;;  %v3857_v20 = vld [vmem:[#allocation2 + $0x188] sm:$0xf0]  ;;  %v2858_v23 = vor.u32 %v3836_v14, %v2857_v13  ;;  %v2750_v27 = vor.u32 %v3809_v15, %v2749_v12 }
  0x48   : > { %1502 = vmatpush.bf16.msra.mxu2 %v2978_v56  ;;  %1514 = vmatpush.bf16.msra.mxu3 %v3086_v59  ;;  %v3409_v22 = vld [vmem:[#allocation2 + $0x528] sm:$0xf]  ;;  %v3974_v24 = vld [vmem:[#allocation2 + $0x530] sm:$0xf0]  ;;  %v3049_v25 = vld [vmem:[#allocation2 + $0x258] sm:$0xf]  ;;  %v3218_v30 = vor.u32 %v3926_v18, %v3217_v17  ;;  %v2942_v31 = vor.u32 %v3857_v20, %v2941_v19 }
  0x49   : > { %1489 = vmatpush.bf16.msra.mxu1 %v2882_v60  ;;  %v3884_v26 = vld [vmem:[#allocation2 + $0x260] sm:$0xf0]  ;;  %v2845_v28 = vld [vmem:[#allocation2 + $0xc0] sm:$0xf]  ;;  %v3833_v29 = vld [vmem:[#allocation2 + $0xc8] sm:$0xf0]  ;;  %v3410_v36 = vor.u32 %v3974_v24, %v3409_v22 }
  0x4a   : > { %v3205_v32 = vld [vmem:[#allocation2 + $0x390] sm:$0xf]  ;;  %v3313_v33 = vld [vmem:[#allocation2 + $0x468] sm:$0xf]  ;;  %v3950_v34 = vld [vmem:[#allocation2 + $0x470] sm:$0xf0]  ;;  %v3050_v37 = vor.u32 %v3884_v26, %v3049_v25  ;;  %v2846_v40 = vor.u32 %v3833_v29, %v2845_v28 }
  0x4b   : > { %1477 = vmatpush.bf16.msra.mxu0 %v2774_v63  ;;  %v3923_v35 = vld [vmem:[#allocation2 + $0x398] sm:$0xf0]  ;;  %v3397_v38 = vld [vmem:[#allocation2 + $0x510] sm:$0xf]  ;;  %v3037_v41 = vld [vmem:[#allocation2 + $0x240] sm:$0xf]  ;;  %v3314_v44 = vor.u32 %v3950_v34, %v3313_v33 }
  0x4c   : > { %1503 = vmatpush.bf16.msra.mxu2 %v2966_v4  ;;  %1515 = vmatpush.bf16.msra.mxu3 %v3074_v7  ;;  %v3971_v39 = vld [vmem:[#allocation2 + $0x518] sm:$0xf0]  ;;  %v3881_v42 = vld [vmem:[#allocation2 + $0x248] sm:$0xf0]  ;;  %v2835_v46 = vld [vmem:[#allocation2 + $0xb4] sm:$0xf0]  ;;  %v3206_v48 = vor.u32 %v3923_v35, %v3205_v32 }
  0x4d   : > { %1490 = vmatpush.bf16.msra.mxu1 %v2870_v8  ;;  %v316_v43 = vld [vmem:[%s4732_s0 + $0x8] sm:$0xff]  ;;  %v3301_v49 = vld [vmem:[#allocation2 + $0x450] sm:$0xf]  ;;  %v3947_v50 = vld [vmem:[#allocation2 + $0x458] sm:$0xf0]  ;;  %v3398_v53 = vor.u32 %v3971_v39, %v3397_v38  ;;  %v3038_v54 = vor.u32 %v3881_v42, %v3037_v41 }
  0x4e   : > { %v3829_v45 = vld [vmem:[#allocation2 + $0xac] sm:$0xf]  ;;  %v557_v47 = vunpack.c.l.b16 %v316_v43  ;;  %v3193_v51 = vld [vmem:[#allocation2 + $0x378] sm:$0xf]  ;;  %v3920_v52 = vld [vmem:[#allocation2 + $0x380] sm:$0xf0]  ;;  %v558_v57 = vunpack.c.h.b16 %v316_v43  ;;  %v3302_v63 = vor.u32 %v3947_v50, %v3301_v49 }
  0x4f   : > { %1478 = vmatpush.bf16.msra.mxu0 %v2762_v11  ;;  %v315_v56 = vld [vmem:[%s4732_s0] sm:$0xff]  ;;  %v3385_v58 = vld [vmem:[#allocation2 + $0x4f8] sm:$0xf]  ;;  %v2838_v60 = vor.u32 %v3829_v45, %v2835_v46  ;;  %v3826_v0 = vld [vmem:[#allocation2 + $0x94] sm:$0xf]  ;;  %v3194_v2 = vor.u32 %v3920_v52, %v3193_v51 }
  0x50   : > { %1504 = vmatpush.bf16.msra.mxu2 %v2954_v16  ;;  %1516 = vmatpush.bf16.msra.mxu3 %v3062_v21  ;;  %v4432_v55 = vpack.c.b16 %v557_v47, %v557_v47  ;;  %v3968_v59 = vld [vmem:[#allocation2 + $0x500] sm:$0xf0]  ;;  %v555_v61 = vunpack.c.l.b16 %v315_v56  ;;  %v556_v62 = vunpack.c.h.b16 %v315_v56  ;;  %v2823_v1 = vld [vmem:[#allocation2 + $0x9c] sm:$0xf0]  ;;  %v3289_v3 = vld [vmem:[#allocation2 + $0x438] sm:$0xf]  ;;  %v4442_v10 = vpack.c.b16 %v558_v57, %v558_v57 }
  0x51   : > { %1491 = vmatpush.bf16.msra.mxu1 %v2858_v23  ;;  %v3944_v4 = vld [vmem:[#allocation2 + $0x440] sm:$0xf0]  ;;  %v3181_v7 = vld [vmem:[#allocation2 + $0x360] sm:$0xf]  ;;  %v3917_v8 = vld [vmem:[#allocation2 + $0x368] sm:$0xf0]  ;;  %v3386_v9 = vor.u32 %v3968_v59, %v3385_v58  ;;  %v2826_v13 = vor.u32 %v3826_v0, %v2823_v1 }
  0x52   : > { %v4438_v5 = vpack.c.b16 %v555_v61, %v555_v61  ;;  %v4440_v6 = vpack.c.b16 %v556_v62, %v556_v62  ;;  %v3373_v11 = vld [vmem:[#allocation2 + $0x4e0] sm:$0xf]  ;;  %v3965_v12 = vld [vmem:[#allocation2 + $0x4e8] sm:$0xf0]  ;;  %v3290_v14 = vor.u32 %v3944_v4, %v3289_v3  ;;  %v3823_v15 = vld [vmem:[#allocation2 + $0x7c] sm:$0xf]  ;;  %v3182_v17 = vor.u32 %v3917_v8, %v3181_v7 }
  0x53   : > { %1479 = vmatpush.bf16.msra.mxu0 %v2750_v27  ;;  %v2811_v16 = vld [vmem:[#allocation2 + $0x84] sm:$0xf0]  ;;  %v3277_v18 = vld [vmem:[#allocation2 + $0x420] sm:$0xf]  ;;  %v3941_v19 = vld [vmem:[#allocation2 + $0x428] sm:$0xf0]  ;;  %v3374_v22 = vor.u32 %v3965_v12, %v3373_v11 }
  0x54   : > { %1505 = vmatpush.bf16.msra.mxu2 %v2942_v31  ;;  %1517 = vmatpush.bf16.msra.mxu3 %v3050_v37  ;;  %v3169_v20 = vld [vmem:[#allocation2 + $0x348] sm:$0xf]  ;;  %v3914_v21 = vld [vmem:[#allocation2 + $0x350] sm:$0xf0]  ;;  %v2814_v25 = vor.u32 %v3823_v15, %v2811_v16  ;;  %v3278_v26 = vor.u32 %v3941_v19, %v3277_v18  ;;  %v3820_v27 = vld [vmem:[#allocation2 + $0x64] sm:$0xf] }
  0x55   : > { %1492 = vmatpush.bf16.msra.mxu1 %v2846_v40  ;;  %v3361_v23 = vld [vmem:[#allocation2 + $0x4c8] sm:$0xf]  ;;  %v3962_v24 = vld [vmem:[#allocation2 + $0x4d0] sm:$0xf0]  ;;  %v2799_v28 = vld [vmem:[#allocation2 + $0x6c] sm:$0xf0]  ;;  %v3170_v29 = vor.u32 %v3914_v21, %v3169_v20 }
  0x56   : > { %1480 = vmatmul.bf16.vlgmr.msra.gmra.mxu0 %v4438_v5  ;;  %v3938_v31 = vld [vmem:[#allocation2 + $0x410] sm:$0xf0]  ;;  %v3157_v32 = vld [vmem:[#allocation2 + $0x330] sm:$0xf]  ;;  %v3911_v33 = vld [vmem:[#allocation2 + $0x338] sm:$0xf0]  ;;  %v3362_v34 = vor.u32 %v3962_v24, %v3361_v23  ;;  %v2802_v37 = vor.u32 %v3820_v27, %v2799_v28 }
  0x57   : > { %1524 = vmatpush.bf16.msrb.mxu0 %v3218_v30  ;;  %1506 = vmatmul.bf16.vlgmr.msra.gmra.mxu2 %v4432_v55  ;;  %v3265_v30 = vld [vmem:[#allocation2 + $0x408] sm:$0xf]  ;;  %v3349_v35 = vld [vmem:[#allocation2 + $0x4b0] sm:$0xf]  ;;  %v3817_v39 = vld [vmem:[#allocation2 + $0x4c] sm:$0xf]  ;;  %v3158_v41 = vor.u32 %v3911_v33, %v3157_v32 }
  0x58   : > { %1550 = vmatpush.bf16.msrb.mxu2 %v3410_v36  ;;  %1518 = vmatpush.bf16.msra.mxu3 %v3038_v54  ;;  %v3959_v36 = vld [vmem:[#allocation2 + $0x4b8] sm:$0xf0]  ;;  %v3266_v38 = vor.u32 %v3938_v31, %v3265_v30  ;;  %v2787_v40 = vld [vmem:[#allocation2 + $0x54] sm:$0xf0]  ;;  %v3253_v42 = vld [vmem:[#allocation2 + $0x3f0] sm:$0xf] }
  0x59   : > { %1537 = vmatpush.bf16.msrb.mxu1 %v3314_v44  ;;  %v3935_v43 = vld [vmem:[#allocation2 + $0x3f8] sm:$0xf0]  ;;  %v3145_v44 = vld [vmem:[#allocation2 + $0x318] sm:$0xf]  ;;  %v3908_v45 = vld [vmem:[#allocation2 + $0x320] sm:$0xf0]  ;;  %v3350_v46 = vor.u32 %v3959_v36, %v3349_v35  ;;  %v2790_v49 = vor.u32 %v3817_v39, %v2787_v40 }
  0x5a   : > { %1493 = vmatmul.bf16.vlgmr.msra.gmra.mxu1 %v4440_v6  ;;  %v3337_v47 = vld [vmem:[#allocation2 + $0x498] sm:$0xf]  ;;  %v3133_v50 = vld [vmem:[#allocation2 + $0x300] sm:$0xf]  ;;  %v3905_v51 = vld [vmem:[#allocation2 + $0x308] sm:$0xf0]  ;;  %v3254_v52 = vor.u32 %v3935_v43, %v3253_v42  ;;  %v3146_v56 = vor.u32 %v3908_v45, %v3145_v44 }
  0x5b   : > { %1525 = vmatpush.bf16.msrb.mxu0 %v3206_v48  ;;  %1519 = vmatmul.bf16.vlgmr.msra.gmra.mxu3 %v4442_v10  ;;  %v3956_v48 = vld [vmem:[#allocation2 + $0x4a0] sm:$0xf0]  ;;  %v2775_v54 = vld [vmem:[#allocation2 + $0x3c] sm:$0xf0]  ;;  %v3241_v57 = vld [vmem:[#allocation2 + $0x3d8] sm:$0xf]  ;;  %v3134_v12 = vor.u32 %v3905_v51, %v3133_v50 }
  0x5c   : > { %1551 = vmatpush.bf16.msrb.mxu2 %v3398_v53  ;;  %1563 = vmatpush.bf16.msrb.mxu3 %v2838_v60  ;;  %v3814_v53 = vld [vmem:[#allocation2 + $0x34] sm:$0xf]  ;;  %v3932_v58 = vld [vmem:[#allocation2 + $0x3e0] sm:$0xf0]  ;;  %v3338_v60 = vor.u32 %v3956_v48, %v3337_v47  ;;  %v3853_v61 = vld [vmem:[#allocation2 + $0x16c] sm:$0xf] }
  0x5d   : > { %1538 = vmatpush.bf16.msrb.mxu1 %v3302_v63  ;;  %v317_v59 = vld [vmem:[%s4732_s0 + $0x10] sm:$0xff]  ;;  %v2931_v62 = vld [vmem:[#allocation2 + $0x174] sm:$0xf0]  ;;  %v3325_v0 = vld [vmem:[#allocation2 + $0x480] sm:$0xf]  ;;  %v3242_v4 = vor.u32 %v3932_v58, %v3241_v57 }
  0x5e   : > { %v318_v63 = vld [vmem:[%s4732_s0 + $0x18] sm:$0xf]  ;;  %v3953_v1 = vld [vmem:[#allocation2 + $0x488] sm:$0xf0]  ;;  %v3811_v3 = vld [vmem:[#allocation2 + $0x1c] sm:$0xf]  ;;  %v559_v7 = vunpack.c.l.b16 %v317_v59  ;;  %v2934_v16 = vor.u32 %v3853_v61, %v2931_v62  ;;  %v560_v23 = vunpack.c.h.b16 %v317_v59 }
  0x5f   : > { %1526 = vmatpush.bf16.msrb.mxu0 %v3194_v2  ;;  %v2778_v2 = vor.u32 %v3814_v53, %v2775_v54  ;;  %v2763_v8 = vld [vmem:[#allocation2 + $0x24] sm:$0xf0]  ;;  %v3123_v11 = vld [vmem:[#allocation2 + $0x2f4] sm:$0xf0]  ;;  %v3929_v15 = vld [vmem:[#allocation2 + $0x3c8] sm:$0xf0] }
  0x60   : > { %1552 = vmatpush.bf16.msrb.mxu2 %v3386_v9  ;;  %1564 = vmatpush.bf16.msrb.mxu3 %v2826_v13  ;;  %v3901_v9 = vld [vmem:[#allocation2 + $0x2ec] sm:$0xf]  ;;  %v561_v13 = vunpack.c.l.b16 %v318_v63  ;;  %v3027_v19 = vld [vmem:[#allocation2 + $0x234] sm:$0xf0]  ;;  %v3850_v20 = vld [vmem:[#allocation2 + $0x154] sm:$0xf]  ;;  %v4457_v40 = vpack.c.b16 %v560_v23, %v560_v23 }
  0x61   : > { %1539 = vmatpush.bf16.msrb.mxu1 %v3290_v14  ;;  %v3229_v14 = vld [vmem:[#allocation2 + $0x3c0] sm:$0xf]  ;;  %v3877_v18 = vld [vmem:[#allocation2 + $0x22c] sm:$0xf]  ;;  %v3126_v24 = vor.u32 %v3901_v9, %v3123_v11  ;;  %v3808_v27 = vld [vmem:[#allocation2 + $0x4] sm:$0xf] }
  0x62   : > { %v2919_v21 = vld [vmem:[#allocation2 + $0x15c] sm:$0xf0]  ;;  %v2751_v28 = vld [vmem:[#allocation2 + $0xc] sm:$0xf0]  ;;  %v4455_v30 = vpack.c.b16 %v561_v13, %v561_v13  ;;  %v3030_v31 = vor.u32 %v3877_v18, %v3027_v19  ;;  %v3219_v32 = vld [vmem:[#allocation2 + $0x3b4] sm:$0xf0] }
  0x63   : > { %1527 = vmatpush.bf16.msrb.mxu0 %v3182_v17  ;;  %v3326_v17 = vor.u32 %v3953_v1, %v3325_v0  ;;  %v3898_v33 = vld [vmem:[#allocation2 + $0x2d4] sm:$0xf]  ;;  %v2922_v35 = vor.u32 %v3850_v20, %v2919_v21  ;;  %v2907_v39 = vld [vmem:[#allocation2 + $0x144] sm:$0xf0]  ;;  %v3895_v47 = vld [vmem:[#allocation2 + $0x2bc] sm:$0xf] }
  0x64   : > { %1553 = vmatpush.bf16.msrb.mxu2 %v3374_v22  ;;  %1565 = vmatpush.bf16.msrb.mxu3 %v2814_v25  ;;  %v2766_v22 = vor.u32 %v3811_v3, %v2763_v8  ;;  %v3230_v25 = vor.u32 %v3929_v15, %v3229_v14  ;;  %v3874_v36 = vld [vmem:[#allocation2 + $0x214] sm:$0xf]  ;;  %v3099_v48 = vld [vmem:[#allocation2 + $0x2c4] sm:$0xf0]  ;;  %v3871_v50 = vld [vmem:[#allocation2 + $0x1fc] sm:$0xf] }
  0x65   : > { %1540 = vmatpush.bf16.msrb.mxu1 %v3278_v26  ;;  %v4453_v26 = vpack.c.b16 %v559_v7, %v559_v7  ;;  %v3922_v44 = vld [vmem:[#allocation2 + $0x394] sm:$0xf]  ;;  %v3003_v51 = vld [vmem:[#allocation2 + $0x204] sm:$0xf0]  ;;  %v2895_v53 = vld [vmem:[#allocation2 + $0x12c] sm:$0xf0] }
  0x66   : > { %v3919_v57 = vld [vmem:[#allocation2 + $0x37c] sm:$0xf]  ;;  %v3006_v58 = vor.u32 %v3871_v50, %v3003_v51  ;;  %v3195_v59 = vld [vmem:[#allocation2 + $0x384] sm:$0xf0]  ;;  %v3087_v61 = vld [vmem:[#allocation2 + $0x2ac] sm:$0xf0] }
  0x67   : > { %1528 = vmatpush.bf16.msrb.mxu0 %v3170_v29  ;;  %v3925_v29 = vld [vmem:[#allocation2 + $0x3ac] sm:$0xf]  ;;  %v3868_v63 = vld [vmem:[#allocation2 + $0x1e4] sm:$0xf]  ;;  %v2991_v0 = vld [vmem:[#allocation2 + $0x1ec] sm:$0xf0]  ;;  %v3198_v3 = vor.u32 %v3919_v57, %v3195_v59 }
  0x68   : > { %1554 = vmatpush.bf16.msrb.mxu2 %v3362_v34  ;;  %1566 = vmatpush.bf16.msrb.mxu3 %v2802_v37  ;;  %v3111_v34 = vld [vmem:[#allocation2 + $0x2dc] sm:$0xf0]  ;;  %v3222_v42 = vor.u32 %v3925_v29, %v3219_v32  ;;  %v3841_v1 = vld [vmem:[#allocation2 + $0x10c] sm:$0xf]  ;;  %v3916_v7 = vld [vmem:[#allocation2 + $0x364] sm:$0xf]  ;;  %v2994_v8 = vor.u32 %v3868_v63, %v2991_v0 }
  0x69   : > { %1541 = vmatpush.bf16.msrb.mxu1 %v3266_v38  ;;  %v3015_v37 = vld [vmem:[#allocation2 + $0x21c] sm:$0xf0]  ;;  %v3847_v38 = vld [vmem:[#allocation2 + $0x13c] sm:$0xf]  ;;  %v3114_v43 = vor.u32 %v3898_v33, %v3111_v34  ;;  %v3183_v9 = vld [vmem:[#allocation2 + $0x36c] sm:$0xf0] }
  0x6a   : > { %v3018_v45 = vor.u32 %v3874_v36, %v3015_v37  ;;  %v3889_v11 = vld [vmem:[#allocation2 + $0x28c] sm:$0xf]  ;;  %v2979_v15 = vld [vmem:[#allocation2 + $0x1d4] sm:$0xf0]  ;;  %v3186_v18 = vor.u32 %v3916_v7, %v3183_v9  ;;  %v3886_v23 = vld [vmem:[#allocation2 + $0x274] sm:$0xf] }
  0x6b   : > { %1529 = vmatpush.bf16.msrb.mxu0 %v3158_v41  ;;  %v2754_v41 = vor.u32 %v3808_v27, %v2751_v28  ;;  %v3865_v14 = vld [vmem:[#allocation2 + $0x1cc] sm:$0xf]  ;;  %v3862_v27 = vld [vmem:[#allocation2 + $0x1b4] sm:$0xf]  ;;  %v2967_v28 = vld [vmem:[#allocation2 + $0x1bc] sm:$0xf0] }
  0x6c   : > { %1555 = vmatpush.bf16.msrb.mxu2 %v3350_v46  ;;  %1567 = vmatpush.bf16.msrb.mxu3 %v2790_v49  ;;  %v3207_v46 = vld [vmem:[#allocation2 + $0x39c] sm:$0xf0]  ;;  %v2910_v49 = vor.u32 %v3847_v38, %v2907_v39  ;;  %v3913_v20 = vld [vmem:[#allocation2 + $0x34c] sm:$0xf]  ;;  %v2982_v21 = vor.u32 %v3865_v14, %v2979_v15  ;;  %v3835_v29 = vld [vmem:[#allocation2 + $0xdc] sm:$0xf] }
  0x6d   : > { %1542 = vmatpush.bf16.msrb.mxu1 %v3254_v52  ;;  %v3844_v52 = vld [vmem:[#allocation2 + $0x124] sm:$0xf]  ;;  %v3210_v54 = vor.u32 %v3922_v44, %v3207_v46  ;;  %v3910_v34 = vld [vmem:[#allocation2 + $0x334] sm:$0xf]  ;;  %v3159_v36 = vld [vmem:[#allocation2 + $0x33c] sm:$0xf0] }
  0x6e   : > { %v2898_v62 = vor.u32 %v3844_v52, %v2895_v53  ;;  %v3883_v37 = vld [vmem:[#allocation2 + $0x25c] sm:$0xf]  ;;  %v3051_v38 = vld [vmem:[#allocation2 + $0x264] sm:$0xf0]  ;;  %v2847_v44 = vld [vmem:[#allocation2 + $0xcc] sm:$0xf0] }
  0x6f   : > { %1530 = vmatpush.bf16.msrb.mxu0 %v3146_v56  ;;  %v3102_v56 = vor.u32 %v3895_v47, %v3099_v48  ;;  %v3315_v46 = vld [vmem:[#allocation2 + $0x474] sm:$0xf0]  ;;  %v3162_v47 = vor.u32 %v3910_v34, %v3159_v36  ;;  %v3054_v48 = vor.u32 %v3883_v37, %v3051_v38  ;;  %v3907_v50 = vld [vmem:[#allocation2 + $0x31c] sm:$0xf]  ;;  %v3147_v52 = vld [vmem:[#allocation2 + $0x324] sm:$0xf0] }
  0x70   : > { %1556 = vmatpush.bf16.msrb.mxu2 %v3338_v60  ;;  %1568 = vmatpush.bf16.msrb.mxu3 %v2778_v2  ;;  %v3892_v60 = vld [vmem:[#allocation2 + $0x2a4] sm:$0xf]  ;;  %v2883_v2 = vld [vmem:[#allocation2 + $0x114] sm:$0xf0]  ;;  %v2943_v57 = vld [vmem:[#allocation2 + $0x18c] sm:$0xf0] }
  0x71   : > { %1543 = vmatpush.bf16.msrb.mxu1 %v3242_v4  ;;  %v3090_v4 = vor.u32 %v3892_v60, %v3087_v61  ;;  %v2886_v13 = vor.u32 %v3841_v1, %v2883_v2  ;;  %v3880_v53 = vld [vmem:[#allocation2 + $0x244] sm:$0xf]  ;;  %v3831_v59 = vld [vmem:[#allocation2 + $0xb8] sm:$0xf0]  ;;  %v3973_v61 = vld [vmem:[#allocation2 + $0x52c] sm:$0xf]  ;;  %v3150_v1 = vor.u32 %v3907_v50, %v3147_v52 }
  0x72   : > { %v3946_v63 = vld [vmem:[#allocation2 + $0x454] sm:$0xf]  ;;  %v3303_v0 = vld [vmem:[#allocation2 + $0x45c] sm:$0xf0]  ;;  %v3904_v7 = vld [vmem:[#allocation2 + $0x304] sm:$0xf] }
  0x73   : > { %1531 = vmatpush.bf16.msrb.mxu0 %v3134_v12  ;;  %v3075_v12 = vld [vmem:[#allocation2 + $0x294] sm:$0xf0]  ;;  %v2937_v9 = vld [vmem:[#allocation2 + $0x170] sm:$0xf]  ;;  %v3828_v14 = vld [vmem:[#allocation2 + $0xa0] sm:$0xf0]  ;;  %v3306_v15 = vor.u32 %v3946_v63, %v3303_v0 }
  0x74   : > { %1557 = vmatpush.bf16.msrb.mxu2 %v3326_v17  ;;  %1569 = vmatpush.bf16.msrb.mxu3 %v2766_v22  ;;  %v2871_v17 = vld [vmem:[#allocation2 + $0xfc] sm:$0xf0]  ;;  %v3078_v19 = vor.u32 %v3889_v11, %v3075_v12  ;;  %v3171_v22 = vld [vmem:[#allocation2 + $0x354] sm:$0xf0]  ;;  %v3855_v12 = vld [vmem:[#allocation2 + $0x178] sm:$0xf0] }
  0x75   : > { %1544 = vmatpush.bf16.msrb.mxu1 %v3230_v25  ;;  %v3174_v32 = vor.u32 %v3913_v20, %v3171_v22  ;;  %v3279_v34 = vld [vmem:[#allocation2 + $0x42c] sm:$0xf0]  ;;  %v2913_v37 = vld [vmem:[#allocation2 + $0x140] sm:$0xf]  ;;  %v2901_v50 = vld [vmem:[#allocation2 + $0x128] sm:$0xf] }
  0x76   : > { %1532 = vmatmul.bf16.vlgmr.msrb.gmra.mxu0 %v4453_v26  ;;  %v3846_v52 = vld [vmem:[#allocation2 + $0x130] sm:$0xf0]  ;;  %v2889_v63 = vld [vmem:[#allocation2 + $0x110] sm:$0xf] }
  0x77   : > { %1576 = vmatpush.bf16.msra.mxu0 %v2934_v16  ;;  %1558 = vmatmul.bf16.vlgmr.msrb.gmra.mxu2 %v4455_v30  ;;  %v3838_v16 = vld [vmem:[#allocation2 + $0xf4] sm:$0xf] }
  0x78   : > { %1602 = vmatpush.bf16.msra.mxu2 %v3126_v24  ;;  %1545 = vmatmul.bf16.vlgmr.msrb.gmra.mxu1 %v4457_v40  ;;  %v3063_v24 = vld [vmem:[#allocation2 + $0x27c] sm:$0xf0]  ;;  %v2874_v25 = vor.u32 %v3838_v16, %v2871_v17  ;;  %v3970_v16 = vld [vmem:[#allocation2 + $0x514] sm:$0xf] }
  0x79   : > { %1589 = vmatpush.bf16.msra.mxu1 %v3030_v31  ;;  %1570 = vmatpush.bf16.msrb.mxu3 %v2754_v41  ;;  %v2859_v31 = vld [vmem:[#allocation2 + $0xe4] sm:$0xf0]  ;;  %v3066_v33 = vor.u32 %v3886_v23, %v3063_v24  ;;  %v3859_v41 = vld [vmem:[#allocation2 + $0x19c] sm:$0xf]  ;;  %v3399_v17 = vld [vmem:[#allocation2 + $0x51c] sm:$0xf0] }
  0x7a   : > { %v2862_v39 = vor.u32 %v3835_v29, %v2859_v31  ;;  %v2925_v23 = vld [vmem:[#allocation2 + $0x158] sm:$0xf]  ;;  %v3402_v24 = vor.u32 %v3970_v16, %v3399_v17  ;;  %v3967_v31 = vld [vmem:[#allocation2 + $0x4fc] sm:$0xf]  ;;  %v3840_v16 = vld [vmem:[#allocation2 + $0x100] sm:$0xf0] }
  0x7b   : > { %1577 = vmatpush.bf16.msra.mxu0 %v2922_v35  ;;  %v2970_v35 = vor.u32 %v3862_v27, %v2967_v28  ;;  %v2817_v27 = vld [vmem:[#allocation2 + $0x80] sm:$0xf]  ;;  %v3825_v28 = vld [vmem:[#allocation2 + $0x88] sm:$0xf0] }
  0x7c   : > { %1603 = vmatpush.bf16.msra.mxu2 %v3114_v43  ;;  %1571 = vmatmul.bf16.vlgmr.msrb.gmra.mxu3 %v4438_v5  ;;  %v3832_v43 = vld [vmem:[#allocation2 + $0xc4] sm:$0xf]  ;;  %v2818_v36 = vor.u32 %v3825_v28, %v2817_v27  ;;  %v2769_v17 = vld [vmem:[#allocation2 + $0x20] sm:$0xf] }
  0x7d   : > { %1615 = vmatpush.bf16.msra.mxu3 %v3222_v42  ;;  %1590 = vmatpush.bf16.msra.mxu1 %v3018_v45  ;;  %v2955_v42 = vld [vmem:[#allocation2 + $0x1a4] sm:$0xf0]  ;;  %v3949_v45 = vld [vmem:[#allocation2 + $0x46c] sm:$0xf] }
  0x7e   : > { %v2958_v51 = vor.u32 %v3859_v41, %v2955_v42  ;;  %v3318_v60 = vor.u32 %v3949_v45, %v3315_v46  ;;  %v2805_v41 = vld [vmem:[#allocation2 + $0x68] sm:$0xf]  ;;  %v3822_v42 = vld [vmem:[#allocation2 + $0x70] sm:$0xf0]  ;;  %v3375_v45 = vld [vmem:[#allocation2 + $0x4ec] sm:$0xf0] }
  0x7f   : > { %1578 = vmatpush.bf16.msra.mxu0 %v2910_v49  ;;  %v3856_v49 = vld [vmem:[#allocation2 + $0x184] sm:$0xf]  ;;  %v3937_v46 = vld [vmem:[#allocation2 + $0x40c] sm:$0xf] }
  0x80   : > { %1604 = vmatpush.bf16.msra.mxu2 %v3102_v56  ;;  %v2850_v56 = vor.u32 %v3832_v43, %v2847_v44  ;;  %v3964_v44 = vld [vmem:[#allocation2 + $0x4e4] sm:$0xf] }
  0x81   : > { %1616 = vmatpush.bf16.msra.mxu3 %v3210_v54  ;;  %1591 = vmatpush.bf16.msra.mxu1 %v3006_v58  ;;  %v3039_v54 = vld [vmem:[#allocation2 + $0x24c] sm:$0xf0] }
  0x82   : > { %v2841_v58 = vld [vmem:[#allocation2 + $0xb0] sm:$0xf]  ;;  %v3042_v2 = vor.u32 %v3880_v53, %v3039_v54  ;;  %v3819_v54 = vld [vmem:[#allocation2 + $0x58] sm:$0xf0] }
  0x83   : > { %1579 = vmatpush.bf16.msra.mxu0 %v2898_v62  ;;  %v3411_v62 = vld [vmem:[#allocation2 + $0x534] sm:$0xf0]  ;;  %v2793_v53 = vld [vmem:[#allocation2 + $0x50] sm:$0xf] }
  0x84   : > { %1605 = vmatpush.bf16.msra.mxu2 %v3090_v4  ;;  %v2842_v4 = vor.u32 %v3831_v59, %v2841_v58  ;;  %v3414_v11 = vor.u32 %v3973_v61, %v3411_v62  ;;  %v3363_v58 = vld [vmem:[#allocation2 + $0x4d4] sm:$0xf0]  ;;  %v3934_v59 = vld [vmem:[#allocation2 + $0x3f4] sm:$0xf]  ;;  %v2902_v61 = vor.u32 %v3846_v52, %v2901_v50  ;;  %v2794_v62 = vor.u32 %v3819_v54, %v2793_v53  ;;  %v3321_v52 = vld [vmem:[#allocation2 + $0x470] sm:$0xf] }
  0x85   : > { %1617 = vmatpush.bf16.msra.mxu3 %v3198_v3  ;;  %1592 = vmatpush.bf16.msra.mxu1 %v2994_v8  ;;  %v2946_v3 = vor.u32 %v3856_v49, %v2943_v57  ;;  %v3135_v8 = vld [vmem:[#allocation2 + $0x30c] sm:$0xf0]  ;;  %v2806_v49 = vor.u32 %v3822_v42, %v2805_v41  ;;  %v3961_v57 = vld [vmem:[#allocation2 + $0x4cc] sm:$0xf]  ;;  %v3927_v41 = vld [vmem:[#allocation2 + $0x3b8] sm:$0xf0] }
  0x86   : > { %v3138_v20 = vor.u32 %v3904_v7, %v3135_v8  ;;  %v3366_v0 = vor.u32 %v3961_v57, %v3363_v58  ;;  %v3958_v7 = vld [vmem:[#allocation2 + $0x4b4] sm:$0xf]  ;;  %v3351_v8 = vld [vmem:[#allocation2 + $0x4bc] sm:$0xf0]  ;;  %v3129_v42 = vld [vmem:[#allocation2 + $0x2f0] sm:$0xf] }
  0x87   : > { %1580 = vmatpush.bf16.msra.mxu0 %v2886_v13  ;;  %v2829_v13 = vld [vmem:[#allocation2 + $0x98] sm:$0xf]  ;;  %v3834_v50 = vld [vmem:[#allocation2 + $0xd0] sm:$0xf0]  ;;  %v3951_v53 = vld [vmem:[#allocation2 + $0x478] sm:$0xf0] }
  0x88   : > { %1606 = vmatpush.bf16.msra.mxu2 %v3078_v19  ;;  %v3291_v19 = vld [vmem:[#allocation2 + $0x444] sm:$0xf0]  ;;  %v2830_v22 = vor.u32 %v3828_v14, %v2829_v13  ;;  %v2877_v14 = vld [vmem:[#allocation2 + $0xf8] sm:$0xf]  ;;  %v3924_v58 = vld [vmem:[#allocation2 + $0x3a0] sm:$0xf0] }
  0x89   : > { %1618 = vmatpush.bf16.msra.mxu3 %v3186_v18  ;;  %1593 = vmatpush.bf16.msra.mxu1 %v2982_v21  ;;  %v3943_v18 = vld [vmem:[#allocation2 + $0x43c] sm:$0xf]  ;;  %v2938_v21 = vor.u32 %v3855_v12, %v2937_v9  ;;  %v2878_v27 = vor.u32 %v3840_v16, %v2877_v14  ;;  %v3870_v14 = vld [vmem:[#allocation2 + $0x1f0] sm:$0xf0] }
  0x8a   : > { %v3294_v29 = vor.u32 %v3943_v18, %v3291_v19  ;;  %v3931_v9 = vld [vmem:[#allocation2 + $0x3dc] sm:$0xf]  ;;  %v3813_v18 = vld [vmem:[#allocation2 + $0x28] sm:$0xf0] }
  0x8b   : > { %1581 = vmatpush.bf16.msra.mxu0 %v2874_v25  ;;  %v3852_v25 = vld [vmem:[#allocation2 + $0x160] sm:$0xf0]  ;;  %v2770_v28 = vor.u32 %v3813_v18, %v2769_v17  ;;  %v3297_v17 = vld [vmem:[#allocation2 + $0x440] sm:$0xf]  ;;  %v3945_v18 = vld [vmem:[#allocation2 + $0x448] sm:$0xf0] }
  0x8c   : > { %1607 = vmatpush.bf16.msra.mxu2 %v3066_v33  ;;  %v3940_v33 = vld [vmem:[#allocation2 + $0x424] sm:$0xf] }
  0x8d   : > { %1619 = vmatpush.bf16.msra.mxu3 %v3174_v32  ;;  %1594 = vmatpush.bf16.msra.mxu1 %v2970_v35  ;;  %v3387_v32 = vld [vmem:[#allocation2 + $0x504] sm:$0xf0]  ;;  %v2926_v35 = vor.u32 %v3852_v25, %v2925_v23  ;;  %v3282_v43 = vor.u32 %v3940_v33, %v3279_v34  ;;  %v3231_v23 = vld [vmem:[#allocation2 + $0x3cc] sm:$0xf0]  ;;  %v3879_v25 = vld [vmem:[#allocation2 + $0x238] sm:$0xf0] }
  0x8e   : > { %v3390_v38 = vor.u32 %v3967_v31, %v3387_v32  ;;  %v3837_v32 = vld [vmem:[#allocation2 + $0xe8] sm:$0xf0]  ;;  %v2757_v33 = vld [vmem:[#allocation2 + $0x8] sm:$0xf]  ;;  %v3810_v34 = vld [vmem:[#allocation2 + $0x10] sm:$0xf0] }
  0x8f   : > { %1582 = vmatpush.bf16.msra.mxu0 %v2862_v39  ;;  %v3849_v39 = vld [vmem:[#allocation2 + $0x148] sm:$0xf0] }
  0x90   : > { %1608 = vmatpush.bf16.msra.mxu2 %v3054_v48  ;;  %v2914_v48 = vor.u32 %v3849_v39, %v2913_v37  ;;  %v3327_v37 = vld [vmem:[#allocation2 + $0x48c] sm:$0xf0] }
  0x91   : > { %1620 = vmatpush.bf16.msra.mxu3 %v3162_v47  ;;  %1595 = vmatpush.bf16.msra.mxu1 %v2958_v51  ;;  %v3267_v47 = vld [vmem:[#allocation2 + $0x414] sm:$0xf0]  ;;  %v3378_v51 = vor.u32 %v3964_v44, %v3375_v45  ;;  %v3876_v45 = vld [vmem:[#allocation2 + $0x220] sm:$0xf0] }
  0x92   : > { %v3021_v44 = vld [vmem:[#allocation2 + $0x218] sm:$0xf] }
  0x93   : > { %1583 = vmatpush.bf16.msra.mxu0 %v2850_v56  ;;  %v3270_v56 = vor.u32 %v3937_v46, %v3267_v47  ;;  %v2758_v47 = vor.u32 %v3810_v34, %v2757_v33  ;;  %v3022_v57 = vor.u32 %v3876_v45, %v3021_v44  ;;  %v3177_v33 = vld [vmem:[#allocation2 + $0x350] sm:$0xf]  ;;  %v3165_v45 = vld [vmem:[#allocation2 + $0x338] sm:$0xf] }
  0x94   : > { %1609 = vmatpush.bf16.msra.mxu2 %v3042_v2  ;;  %v2781_v2 = vld [vmem:[#allocation2 + $0x38] sm:$0xf] }
  0x95   : > { %1621 = vmatpush.bf16.msra.mxu3 %v3150_v1  ;;  %1596 = vmatpush.bf16.msra.mxu1 %v2946_v3  ;;  %v3843_v1 = vld [vmem:[#allocation2 + $0x118] sm:$0xf0]  ;;  %v3816_v3 = vld [vmem:[#allocation2 + $0x40] sm:$0xf0] }
  0x96   : > { %1584 = vmatmul.bf16.vlgmr.msra.gmra.mxu0 %v4440_v6  ;;  %v2890_v12 = vor.u32 %v3843_v1, %v2889_v63  ;;  %v2782_v13 = vor.u32 %v3816_v3, %v2781_v2  ;;  %v3309_v2 = vld [vmem:[#allocation2 + $0x458] sm:$0xf]  ;;  %v3948_v3 = vld [vmem:[#allocation2 + $0x460] sm:$0xf0] }
  0x97   : > { %1628 = vmatpush.bf16.msrb.mxu0 %v3318_v60  ;;  %1610 = vmatmul.bf16.vlgmr.msra.gmra.mxu2 %v4442_v10  ;;  %v3255_v60 = vld [vmem:[#allocation2 + $0x3fc] sm:$0xf0] }
  0x98   : > { %1654 = vmatpush.bf16.msrb.mxu2 %v2842_v4  ;;  %1597 = vmatmul.bf16.vlgmr.msra.gmra.mxu1 %v4432_v55  ;;  %v3258_v4 = vor.u32 %v3934_v59, %v3255_v60  ;;  %v3117_v59 = vld [vmem:[#allocation2 + $0x2d8] sm:$0xf]  ;;  %v3900_v60 = vld [vmem:[#allocation2 + $0x2e0] sm:$0xf0] }
  0x99   : > { %1641 = vmatpush.bf16.msrb.mxu1 %v3414_v11  ;;  %1622 = vmatpush.bf16.msra.mxu3 %v3138_v20  ;;  %v3243_v11 = vld [vmem:[#allocation2 + $0x3e4] sm:$0xf0]  ;;  %v3955_v20 = vld [vmem:[#allocation2 + $0x49c] sm:$0xf] }
  0x9a   : > { %v3246_v19 = vor.u32 %v3931_v9, %v3243_v11  ;;  %v3921_v9 = vld [vmem:[#allocation2 + $0x388] sm:$0xf0]  ;;  %v3105_v11 = vld [vmem:[#allocation2 + $0x2c0] sm:$0xf] }
  0x9b   : > { %1629 = vmatpush.bf16.msrb.mxu0 %v3306_v15  ;;  %v3354_v15 = vor.u32 %v3958_v7, %v3351_v8  ;;  %v3201_v7 = vld [vmem:[#allocation2 + $0x380] sm:$0xf] }
  0x9c   : > { %1655 = vmatpush.bf16.msrb.mxu2 %v2830_v22  ;;  %1623 = vmatmul.bf16.vlgmr.msra.gmra.mxu3 %v4453_v26  ;;  %v3928_v22 = vld [vmem:[#allocation2 + $0x3c4] sm:$0xf]  ;;  %v3202_v16 = vor.u32 %v3921_v9, %v3201_v7  ;;  %v3249_v7 = vld [vmem:[#allocation2 + $0x3e0] sm:$0xf] }
  0x9d   : > { %1667 = vmatpush.bf16.msrb.mxu3 %v2938_v21  ;;  %1642 = vmatpush.bf16.msrb.mxu1 %v3402_v24  ;;  %v3339_v21 = vld [vmem:[#allocation2 + $0x4a4] sm:$0xf0]  ;;  %v3033_v24 = vld [vmem:[#allocation2 + $0x230] sm:$0xf] }
  0x9e   : > { %v3342_v31 = vor.u32 %v3955_v20, %v3339_v21  ;;  %v3034_v39 = vor.u32 %v3879_v25, %v3033_v24  ;;  %v3189_v20 = vld [vmem:[#allocation2 + $0x368] sm:$0xf]  ;;  %v3894_v24 = vld [vmem:[#allocation2 + $0x2b0] sm:$0xf0]  ;;  %v3867_v25 = vld [vmem:[#allocation2 + $0x1d8] sm:$0xf0] }
  0x9f   : > { %1630 = vmatpush.bf16.msrb.mxu0 %v3294_v29  ;;  %v2865_v29 = vld [vmem:[#allocation2 + $0xe0] sm:$0xf] }
  0xa0   : > { %1656 = vmatpush.bf16.msrb.mxu2 %v2818_v36  ;;  %v3952_v36 = vld [vmem:[#allocation2 + $0x484] sm:$0xf]  ;;  %v2866_v46 = vor.u32 %v3837_v32, %v2865_v29  ;;  %v3285_v29 = vld [vmem:[#allocation2 + $0x428] sm:$0xf] }
  0xa1   : > { %1668 = vmatpush.bf16.msrb.mxu3 %v2926_v35  ;;  %1643 = vmatpush.bf16.msrb.mxu1 %v3390_v38  ;;  %v3234_v35 = vor.u32 %v3928_v22, %v3231_v23  ;;  %v3225_v38 = vld [vmem:[#allocation2 + $0x3b0] sm:$0xf]  ;;  %v3918_v22 = vld [vmem:[#allocation2 + $0x370] sm:$0xf0]  ;;  %v3093_v23 = vld [vmem:[#allocation2 + $0x2a8] sm:$0xf] }
  0xa2   : > { %v3094_v32 = vor.u32 %v3894_v24, %v3093_v23 }
  0xa3   : > { %1631 = vmatpush.bf16.msrb.mxu0 %v3282_v43  ;;  %v3903_v43 = vld [vmem:[#allocation2 + $0x2f8] sm:$0xf0] }
  0xa4   : > { %1657 = vmatpush.bf16.msrb.mxu2 %v2806_v49  ;;  %v2853_v49 = vld [vmem:[#allocation2 + $0xc8] sm:$0xf]  ;;  %v3130_v54 = vor.u32 %v3903_v43, %v3129_v42  ;;  %v3273_v42 = vld [vmem:[#allocation2 + $0x410] sm:$0xf]  ;;  %v3939_v43 = vld [vmem:[#allocation2 + $0x418] sm:$0xf0] }
  0xa5   : > { %1669 = vmatpush.bf16.msrb.mxu3 %v2914_v48  ;;  %1644 = vmatpush.bf16.msrb.mxu1 %v3378_v51  ;;  %v3330_v48 = vor.u32 %v3952_v36, %v3327_v37  ;;  %v3226_v51 = vor.u32 %v3927_v41, %v3225_v38  ;;  %v2854_v63 = vor.u32 %v3834_v50, %v2853_v49  ;;  %v3081_v36 = vld [vmem:[#allocation2 + $0x290] sm:$0xf]  ;;  %v3891_v37 = vld [vmem:[#allocation2 + $0x298] sm:$0xf0]  ;;  %v2973_v38 = vld [vmem:[#allocation2 + $0x1b8] sm:$0xf] }
  0xa6   : > { %v3082_v44 = vor.u32 %v3891_v37, %v3081_v36  ;;  %v3888_v49 = vld [vmem:[#allocation2 + $0x280] sm:$0xf0]  ;;  %v2961_v50 = vld [vmem:[#allocation2 + $0x1a0] sm:$0xf] }
  0xa7   : > { %1632 = vmatpush.bf16.msrb.mxu0 %v3270_v56  ;;  %v3213_v56 = vld [vmem:[#allocation2 + $0x398] sm:$0xf]  ;;  %v3960_v36 = vld [vmem:[#allocation2 + $0x4c0] sm:$0xf0] }
  0xa8   : > { %1658 = vmatpush.bf16.msrb.mxu2 %v2794_v62  ;;  %v3873_v62 = vld [vmem:[#allocation2 + $0x208] sm:$0xf0]  ;;  %v3214_v1 = vor.u32 %v3924_v58, %v3213_v56  ;;  %v3936_v56 = vld [vmem:[#allocation2 + $0x400] sm:$0xf0]  ;;  %v3153_v58 = vld [vmem:[#allocation2 + $0x320] sm:$0xf] }
  0xa9   : > { %1670 = vmatpush.bf16.msrb.mxu3 %v2902_v61  ;;  %1645 = vmatpush.bf16.msrb.mxu1 %v3366_v0  ;;  %v3009_v61 = vld [vmem:[#allocation2 + $0x200] sm:$0xf]  ;;  %v3322_v0 = vor.u32 %v3951_v53, %v3321_v52  ;;  %v3274_v52 = vor.u32 %v3939_v43, %v3273_v42  ;;  %v3954_v43 = vld [vmem:[#allocation2 + $0x490] sm:$0xf0] }
  0xaa   : > { %v3010_v8 = vor.u32 %v3873_v62, %v3009_v61  ;;  %v3057_v61 = vld [vmem:[#allocation2 + $0x260] sm:$0xf]  ;;  %v3885_v62 = vld [vmem:[#allocation2 + $0x268] sm:$0xf0] }
  0xab   : > { %1633 = vmatpush.bf16.msrb.mxu0 %v3258_v4  ;;  %v3118_v4 = vor.u32 %v3900_v60, %v3117_v59  ;;  %v3909_v60 = vld [vmem:[#allocation2 + $0x328] sm:$0xf0]  ;;  %v3058_v9 = vor.u32 %v3885_v62, %v3057_v61 }
  0xac   : > { %1659 = vmatpush.bf16.msrb.mxu2 %v2782_v13  ;;  %v2997_v13 = vld [vmem:[#allocation2 + $0x1e8] sm:$0xf] }
  0xad   : > { %1671 = vmatpush.bf16.msrb.mxu3 %v2890_v12  ;;  %1646 = vmatpush.bf16.msrb.mxu1 %v3354_v15  ;;  %v3897_v12 = vld [vmem:[#allocation2 + $0x2c8] sm:$0xf0]  ;;  %v3310_v15 = vor.u32 %v3948_v3, %v3309_v2  ;;  %v2998_v21 = vor.u32 %v3870_v14, %v2997_v13  ;;  %v3975_v2 = vld [vmem:[#allocation2 + $0x538] sm:$0xf0]  ;;  %v3906_v13 = vld [vmem:[#allocation2 + $0x310] sm:$0xf0] }
  0xaf   : > { %1634 = vmatpush.bf16.msrb.mxu0 %v3246_v19  ;;  %v3106_v19 = vor.u32 %v3897_v12, %v3105_v11  ;;  %v3141_v12 = vld [vmem:[#allocation2 + $0x308] sm:$0xf] }
  0xb0   : > { %1660 = vmatpush.bf16.msrb.mxu2 %v2770_v28  ;;  %v3190_v28 = vor.u32 %v3918_v22, %v3189_v20  ;;  %v3142_v20 = vor.u32 %v3906_v13, %v3141_v12  ;;  %v3930_v22 = vld [vmem:[#allocation2 + $0x3d0] sm:$0xf0] }
  0xb1   : > { %1672 = vmatpush.bf16.msrb.mxu3 %v2878_v27  ;;  %1647 = vmatpush.bf16.msrb.mxu1 %v3342_v31  ;;  %v3298_v27 = vor.u32 %v3945_v18, %v3297_v17  ;;  %v3942_v31 = vld [vmem:[#allocation2 + $0x430] sm:$0xf0]  ;;  %v3405_v17 = vld [vmem:[#allocation2 + $0x518] sm:$0xf]  ;;  %v3972_v18 = vld [vmem:[#allocation2 + $0x520] sm:$0xf0] }
  0xb2   : > { %v3406_v24 = vor.u32 %v3972_v18, %v3405_v17 }
  0xb3   : > { %1635 = vmatpush.bf16.msrb.mxu0 %v3234_v35  ;;  %v3915_v35 = vld [vmem:[#allocation2 + $0x358] sm:$0xf0] }
  0xb4   : > { %1661 = vmatpush.bf16.msrb.mxu2 %v2758_v47  ;;  %v3178_v41 = vor.u32 %v3915_v35, %v3177_v33  ;;  %v3912_v47 = vld [vmem:[#allocation2 + $0x340] sm:$0xf0]  ;;  %v3369_v33 = vld [vmem:[#allocation2 + $0x4d0] sm:$0xf] }
  0xb5   : > { %1673 = vmatpush.bf16.msrb.mxu3 %v2866_v46  ;;  %1648 = vmatpush.bf16.msrb.mxu1 %v3330_v48  ;;  %v3069_v48 = vld [vmem:[#allocation2 + $0x278] sm:$0xf]  ;;  %v3166_v53 = vor.u32 %v3912_v47, %v3165_v45 }
  0xb6   : > { %1636 = vmatmul.bf16.vlgmr.msrb.gmra.mxu0 %v4457_v40 }
  0xb7   : > { %1680 = vmatpush.bf16.msra.mxu0 %v3034_v39  ;;  %1662 = vmatmul.bf16.vlgmr.msrb.gmra.mxu2 %v4438_v5  ;;  %v2985_v5 = vld [vmem:[#allocation2 + $0x1d0] sm:$0xf]  ;;  %v3864_v39 = vld [vmem:[#allocation2 + $0x1c0] sm:$0xf0] }
  0xb8   : > { %1706 = vmatpush.bf16.msra.mxu2 %v3226_v51  ;;  %1649 = vmatmul.bf16.vlgmr.msrb.gmra.mxu1 %v4455_v30  ;;  %v2986_v34 = vor.u32 %v3867_v25, %v2985_v5  ;;  %v2974_v46 = vor.u32 %v3864_v39, %v2973_v38  ;;  %v3861_v51 = vld [vmem:[#allocation2 + $0x1a8] sm:$0xf0]  ;;  %v3393_v5 = vld [vmem:[#allocation2 + $0x500] sm:$0xf] }
  0xb9   : > { %1693 = vmatpush.bf16.msra.mxu1 %v3130_v54  ;;  %1674 = vmatpush.bf16.msrb.mxu3 %v2854_v63  ;;  %v3261_v54 = vld [vmem:[#allocation2 + $0x3f8] sm:$0xf]  ;;  %v2962_v59 = vor.u32 %v3861_v51, %v2961_v50  ;;  %v2949_v63 = vld [vmem:[#allocation2 + $0x188] sm:$0xf]  ;;  %v3969_v25 = vld [vmem:[#allocation2 + $0x508] sm:$0xf0] }
  0xba   : > { %v3262_v3 = vor.u32 %v3936_v56, %v3261_v54  ;;  %v3345_v39 = vld [vmem:[#allocation2 + $0x4a0] sm:$0xf] }
  0xbb   : > { %1681 = vmatpush.bf16.msra.mxu0 %v3022_v57  ;;  %v3070_v57 = vor.u32 %v3888_v49, %v3069_v48 }
  0xbc   : > { %1707 = vmatpush.bf16.msra.mxu2 %v3214_v1  ;;  %1675 = vmatmul.bf16.vlgmr.msrb.gmra.mxu3 %v4440_v6  ;;  %v3286_v6 = vor.u32 %v3942_v31, %v3285_v29  ;;  %v3417_v1 = vld [vmem:[#allocation2 + $0x530] sm:$0xf]  ;;  %v3381_v29 = vld [vmem:[#allocation2 + $0x4e8] sm:$0xf]  ;;  %v3966_v31 = vld [vmem:[#allocation2 + $0x4f0] sm:$0xf0] }
  0xbd   : > { %1719 = vmatpush.bf16.msra.mxu3 %v3322_v0  ;;  %1694 = vmatpush.bf16.msra.mxu1 %v3118_v4  ;;  %v3858_v0 = vld [vmem:[#allocation2 + $0x190] sm:$0xf0]  ;;  %v3154_v4 = vor.u32 %v3909_v60, %v3153_v58  ;;  %v3418_v14 = vor.u32 %v3975_v2, %v3417_v1 }
  0xbe   : > { %v2950_v11 = vor.u32 %v3858_v0, %v2949_v63 }
  0xbf   : > { %1682 = vmatpush.bf16.msra.mxu0 %v3010_v8  ;;  %v3933_v8 = vld [vmem:[#allocation2 + $0x3e8] sm:$0xf0] }
  0xc0   : > { %1708 = vmatpush.bf16.msra.mxu2 %v3202_v16  ;;  %v3882_v16 = vld [vmem:[#allocation2 + $0x250] sm:$0xf0] }
  0xc1   : > { %1720 = vmatpush.bf16.msra.mxu3 %v3310_v15  ;;  %1695 = vmatpush.bf16.msra.mxu1 %v3106_v19  ;;  %v3045_v15 = vld [vmem:[#allocation2 + $0x248] sm:$0xf]  ;;  %v3250_v19 = vor.u32 %v3933_v8, %v3249_v7 }
  0xc2   : > { %v3046_v23 = vor.u32 %v3882_v16, %v3045_v15 }
  0xc3   : > { %1683 = vmatpush.bf16.msra.mxu0 %v2998_v21  ;;  %v3237_v21 = vld [vmem:[#allocation2 + $0x3c8] sm:$0xf] }
  0xc4   : > { %1709 = vmatpush.bf16.msra.mxu2 %v3190_v28  ;;  %v3394_v28 = vor.u32 %v3969_v25, %v3393_v5 }
  0xc5   : > { %1721 = vmatpush.bf16.msra.mxu3 %v3298_v27  ;;  %1696 = vmatpush.bf16.msra.mxu1 %v3094_v32  ;;  %v3238_v27 = vor.u32 %v3930_v22, %v3237_v21  ;;  %v3382_v32 = vor.u32 %v3966_v31, %v3381_v29 }
  0xc7   : > { %1684 = vmatpush.bf16.msra.mxu0 %v2986_v34  ;;  %v3963_v34 = vld [vmem:[#allocation2 + $0x4d8] sm:$0xf0] }
  0xc8   : > { %1710 = vmatpush.bf16.msra.mxu2 %v3178_v41  ;;  %v3370_v35 = vor.u32 %v3963_v34, %v3369_v33 }
  0xc9   : > { %1722 = vmatpush.bf16.msra.mxu3 %v3286_v6  ;;  %1697 = vmatpush.bf16.msra.mxu1 %v3082_v44  ;;  %v3957_v6 = vld [vmem:[#allocation2 + $0x4a8] sm:$0xf0] }
  0xca   : > { %v3346_v42 = vor.u32 %v3957_v6, %v3345_v39 }
  0xcb   : > { %1685 = vmatpush.bf16.msra.mxu0 %v2974_v46 }
  0xcc   : > { %1711 = vmatpush.bf16.msra.mxu2 %v3166_v53 }
  0xcd   : > { %1723 = vmatpush.bf16.msra.mxu3 %v3274_v52  ;;  %1698 = vmatpush.bf16.msra.mxu1 %v3070_v57 }
  0xcf   : > { %1686 = vmatpush.bf16.msra.mxu0 %v2962_v59 }
  0xd0   : > { %1712 = vmatpush.bf16.msra.mxu2 %v3154_v4 }
  0xd1   : > { %1724 = vmatpush.bf16.msra.mxu3 %v3262_v3  ;;  %1699 = vmatpush.bf16.msra.mxu1 %v3058_v9 }
  0xd3   : > { %1687 = vmatpush.bf16.msra.mxu0 %v2950_v11  ;;  %v1481_v37 = vpop.f32.mrf.mxu0 }
  0xd4   : > { %1713 = vmatpush.bf16.msra.mxu2 %v3142_v20 }
  0xd5   : > { %1725 = vmatpush.bf16.msra.mxu3 %v3250_v19  ;;  %1700 = vmatpush.bf16.msra.mxu1 %v3046_v23 }
  0xd6   : > { %1688 = vmatmul.bf16.vlgmr.msra.gmra.mxu0 %v4432_v55  ;;  %v3357_v55 = vld [vmem:[#allocation2 + $0x4b8] sm:$0xf] }
  0xd7   : > { %1732 = vmatpush.bf16.msrb.mxu0 %v3418_v14  ;;  %1714 = vmatmul.bf16.vlgmr.msra.gmra.mxu2 %v4453_v26  ;;  %v3358_v38 = vor.u32 %v3960_v36, %v3357_v55  ;;  %v1494_v41 = vpop.f32.mrf.mxu1 }
  0xd8   : > { %1701 = vmatmul.bf16.vlgmr.msra.gmra.mxu1 %v4442_v10  ;;  %v543_v10 = vld [vmem:[%s4734_s2] sm:$0x7] }
  0xd9   : > { %1726 = vmatpush.bf16.msra.mxu3 %v3238_v27  ;;  %v545_v44 = vperm.slane %v543_v10, 0  ;;  %v546_v7 = vperm.slane %v543_v10, 1  ;;  %v547_v31 = vperm.slane %v543_v10, 2 }
  0xda   : > { %v1507_v26 = vpop.f32.mrf.mxu2 }
  0xdb   : > { %1733 = vmatpush.bf16.msrb.mxu0 %v3406_v24  ;;  %v1483_v45 = vpop.f32.mrf.mxu0  ;;  %v1482_v48 = vadd.f32 %v1481_v37, %v545_v44 }
  0xdc   : > { %1727 = vmatmul.bf16.vlgmr.msra.gmra.mxu3 %v4457_v40  ;;  %v3333_v40 = vld [vmem:[#allocation2 + $0x488] sm:$0xf] }
  0xdd   : > { %v3334_v46 = vor.u32 %v3954_v43, %v3333_v40  ;;  %v1495_v51 = vadd.f32 %v1494_v41, %v1482_v48 }
  0xde   : > { %v1520_v47 = vpop.f32.mrf.mxu3 }
  0xdf   : > { %1734 = vmatpush.bf16.msrb.mxu0 %v3394_v28  ;;  %v1496_v49 = vpop.f32.mrf.mxu1  ;;  %v1508_v53 = vadd.f32 %v1507_v26, %v1495_v51 }
  0xe1   : > { %v1521_v54 = vadd.f32 %v1520_v47, %v1508_v53 }
  0xe2   : > { %v1509_v50 = vpop.f32.mrf.mxu2 }
  0xe3   : > { %1735 = vmatpush.bf16.msrb.mxu0 %v3382_v32 }
  0xe6   : > { %v1522_v52 = vpop.f32.mrf.mxu3 }
  0xe7   : > { %1736 = vmatpush.bf16.msrb.mxu0 %v3370_v35 }
  0xeb   : > { %1737 = vmatpush.bf16.msrb.mxu0 %v3358_v38 }
  0xef   : > { %1738 = vmatpush.bf16.msrb.mxu0 %v3346_v42 }
  0xf3   : > { %1739 = vmatpush.bf16.msrb.mxu0 %v3334_v46  ;;  %v1533_v56 = vpop.f32.mrf.mxu0 }
  0xf4   : > { %v1534_v57 = vadd.f32 %v1533_v56, %v1521_v54 }
  0xf5   : > { %v1546_v58 = vpop.f32.mrf.mxu1 }
  0xf6   : > { %1740 = vmatmul.bf16.vlgmr.msrb.gmra.mxu0 %v4455_v30  ;;  %v1547_v59 = vadd.f32 %v1546_v58, %v1534_v57 }
  0xfa   : > { %v1559_v60 = vpop.f32.mrf.mxu2 }
  0xfb   : > { %v1560_v61 = vadd.f32 %v1559_v60, %v1547_v59  ;;  %v1535_v62 = vpop.f32.mrf.mxu0 }
  0xfd   : > { %1745 = vst [vmem:[#allocation7] sm:$0xff] %v1560_v61  ;;  %v1548_v63 = vpop.f32.mrf.mxu1 }
  0xff   : > { %v1572_v0 = vpop.f32.mrf.mxu3 }
 0x100   : > { %v1573_v9 = vadd.f32 %v1572_v0, %v546_v7 }
 0x102   : > { %v1561_v1 = vpop.f32.mrf.mxu2 }
 0x107   : > { %v1574_v2 = vpop.f32.mrf.mxu3 }
 0x113   : > { %v1585_v3 = vpop.f32.mrf.mxu0 }
 0x114   : > { %v1586_v13 = vadd.f32 %v1585_v3, %v1573_v9 }
 0x115   : > { %v1598_v4 = vpop.f32.mrf.mxu1 }
 0x116   : > { %v1599_v15 = vadd.f32 %v1598_v4, %v1586_v13 }
 0x11a   : > { %v1611_v8 = vpop.f32.mrf.mxu2 }
 0x11b   : > { %v1587_v30 = vpop.f32.mrf.mxu0  ;;  %v1612_v17 = vadd.f32 %v1611_v8, %v1599_v15 }
 0x11d   : > { %v1600_v11 = vpop.f32.mrf.mxu1 }
 0x11f   : > { %v1624_v12 = vpop.f32.mrf.mxu3 }
 0x120   : > { %v1625_v18 = vadd.f32 %v1624_v12, %v1612_v17 }
 0x122   : > { %v1613_v14 = vpop.f32.mrf.mxu2 }
 0x127   : > { %v1626_v16 = vpop.f32.mrf.mxu3 }
 0x133   : > { %v1637_v19 = vpop.f32.mrf.mxu0 }
 0x134   : > { %v1638_v20 = vadd.f32 %v1637_v19, %v1625_v18 }
 0x135   : > { %v1650_v21 = vpop.f32.mrf.mxu1 }
 0x136   : > { %v1651_v22 = vadd.f32 %v1650_v21, %v1638_v20 }
 0x138   : > { %1746 = vst [vmem:[#allocation7 + $0x8] sm:$0xff] %v1651_v22 }
 0x13a   : > { %v1663_v24 = vpop.f32.mrf.mxu2 }
 0x13b   : > { %v1639_v23 = vpop.f32.mrf.mxu0  ;;  %v1664_v33 = vadd.f32 %v1663_v24, %v547_v31 }
 0x13d   : > { %v1652_v5 = vpop.f32.mrf.mxu1 }
 0x13f   : > { %v1676_v25 = vpop.f32.mrf.mxu3 }
 0x140   : > { %v1677_v55 = vadd.f32 %v1676_v25, %v1664_v33 }
 0x142   : > { %v1665_v27 = vpop.f32.mrf.mxu2 }
 0x147   : > { %v1678_v28 = vpop.f32.mrf.mxu3 }
 0x153   : > { %v1689_v29 = vpop.f32.mrf.mxu0 }
 0x154   : > { %v1690_v38 = vadd.f32 %v1689_v29, %v1677_v55 }
 0x155   : > { %v1702_v32 = vpop.f32.mrf.mxu1 }
 0x156   : > { %v1703_v6 = vadd.f32 %v1702_v32, %v1690_v38 }
 0x15a   : > { %v1715_v35 = vpop.f32.mrf.mxu2 }
 0x15b   : > { %v1691_v34 = vpop.f32.mrf.mxu0  ;;  %v1716_v26 = vadd.f32 %v1715_v35, %v1703_v6 }
 0x15d   : > { %v1704_v37 = vpop.f32.mrf.mxu1 }
 0x15f   : > { %v1728_v36 = vpop.f32.mrf.mxu3 }
 0x160   : > { %v1729_v42 = vadd.f32 %v1728_v36, %v1716_v26 }
 0x162   : > { %v1717_v39 = vpop.f32.mrf.mxu2 }
 0x167   : > { %v1730_v41 = vpop.f32.mrf.mxu3 }
 0x173   : > { %v1741_v40 = vpop.f32.mrf.mxu0 }
 0x174   : > { %v1742_v43 = vadd.f32 %v1741_v40, %v1729_v42 }
 0x176   : > { %1747 = vst [vmem:[#allocation7 + $0x10] sm:$0xff] %v1742_v43 }
 0x17b   : > { %v1743_v44 = vpop.f32.mrf.mxu0 }
 0x17c PF: > { %v3533_v10 = vld [vmem:[%s4408_s8 + $0xe0] sm:$0xf]  ;;  %v4006_v45 = vld [vmem:[%s4408_s8 + $0xec] sm:$0xf0]  ;;  %v4004_v53 = vld [vmem:[%s4408_s8 + $0xe4] sm:$0xf] }
 0x17d   : > { %v3661_v46 = vld [vmem:[%s4408_s8 + $0x1e0] sm:$0xf]  ;;  %v3534_v47 = vor.u32 %v4006_v45, %v3533_v10  ;;  %v4038_v48 = vld [vmem:[%s4408_s8 + $0x1ec] sm:$0xf0]  ;;  %v3535_v54 = vld [vmem:[%s4408_s8 + $0xf0] sm:$0xf0] }
 0x17e   : > { %v3789_v49 = vld [vmem:[%s4408_s8 + $0x2e0] sm:$0xf]  ;;  %v4070_v50 = vld [vmem:[%s4408_s8 + $0x2ec] sm:$0xf0]  ;;  %v3662_v51 = vor.u32 %v4038_v48, %v3661_v46  ;;  %v3538_v57 = vor.u32 %v4004_v53, %v3535_v54  ;;  %v4000_v1 = vld [vmem:[%s4408_s8 + $0xc4] sm:$0xf] }
 0x17f   : > { %v3790_v52 = vor.u32 %v4070_v50, %v3789_v49  ;;  %v3517_v56 = vld [vmem:[%s4408_s8 + $0xc0] sm:$0xf]  ;;  %2340 = vmatpush.bf16.msra.mxu0 %v3534_v47  ;;  %v4002_v58 = vld [vmem:[%s4408_s8 + $0xcc] sm:$0xf0]  ;;  %v3519_v3 = vld [vmem:[%s4408_s8 + $0xd0] sm:$0xf0] }
 0x180   : > { %v3645_v59 = vld [vmem:[%s4408_s8 + $0x1c0] sm:$0xf]  ;;  %v4034_v60 = vld [vmem:[%s4408_s8 + $0x1cc] sm:$0xf0]  ;;  %2353 = vmatpush.bf16.msra.mxu1 %v3662_v51  ;;  %v3518_v61 = vor.u32 %v4002_v58, %v3517_v56  ;;  %2379 = vmatpush.bf16.msra.mxu3 %v3538_v57  ;;  %v3522_v8 = vor.u32 %v4000_v1, %v3519_v3  ;;  %v3996_v14 = vld [vmem:[%s4408_s8 + $0xa4] sm:$0xf] }
 0x181   : > { %2366 = vmatpush.bf16.msra.mxu2 %v3790_v52  ;;  %v3646_v62 = vor.u32 %v4034_v60, %v3645_v59  ;;  %v3773_v63 = vld [vmem:[%s4408_s8 + $0x2c0] sm:$0xf]  ;;  %v4066_v0 = vld [vmem:[%s4408_s8 + $0x2cc] sm:$0xf0]  ;;  %v3503_v15 = vld [vmem:[%s4408_s8 + $0xb0] sm:$0xf0] }
 0x182   : > { %v3774_v2 = vor.u32 %v4066_v0, %v3773_v63  ;;  %v3501_v4 = vld [vmem:[%s4408_s8 + $0xa0] sm:$0xf]  ;;  %v3998_v7 = vld [vmem:[%s4408_s8 + $0xac] sm:$0xf0]  ;;  %v3506_v21 = vor.u32 %v3996_v14, %v3503_v15  ;;  %v3992_v5 = vld [vmem:[%s4408_s8 + $0x84] sm:$0xf] }
 0x183   : > { %v3629_v30 = vld [vmem:[%s4408_s8 + $0x1a0] sm:$0xf]  ;;  %v4030_v9 = vld [vmem:[%s4408_s8 + $0x1ac] sm:$0xf0]  ;;  %2341 = vmatpush.bf16.msra.mxu0 %v3518_v61  ;;  %v3502_v12 = vor.u32 %v3998_v7, %v3501_v4  ;;  %v3487_v25 = vld [vmem:[%s4408_s8 + $0x90] sm:$0xf0] }
 0x184   : > { %v3757_v11 = vld [vmem:[%s4408_s8 + $0x2a0] sm:$0xf]  ;;  %v4062_v13 = vld [vmem:[%s4408_s8 + $0x2ac] sm:$0xf0]  ;;  %2354 = vmatpush.bf16.msra.mxu1 %v3646_v62  ;;  %v3630_v16 = vor.u32 %v4030_v9, %v3629_v30  ;;  %2380 = vmatpush.bf16.msra.mxu3 %v3522_v8  ;;  %v3490_v34 = vor.u32 %v3992_v5, %v3487_v25  ;;  %v3988_v37 = vld [vmem:[%s4408_s8 + $0x64] sm:$0xf] }
 0x185   : > { %2367 = vmatpush.bf16.msra.mxu2 %v3774_v2  ;;  %v3758_v17 = vor.u32 %v4062_v13, %v3757_v11  ;;  %v3485_v18 = vld [vmem:[%s4408_s8 + $0x80] sm:$0xf]  ;;  %v3994_v19 = vld [vmem:[%s4408_s8 + $0x8c] sm:$0xf0]  ;;  %v3471_v38 = vld [vmem:[%s4408_s8 + $0x70] sm:$0xf0] }
 0x186   : > { %v3613_v20 = vld [vmem:[%s4408_s8 + $0x180] sm:$0xf]  ;;  %v4026_v22 = vld [vmem:[%s4408_s8 + $0x18c] sm:$0xf0]  ;;  %v3486_v27 = vor.u32 %v3994_v19, %v3485_v18  ;;  %v3474_v43 = vor.u32 %v3988_v37, %v3471_v38  ;;  %v3984_v46 = vld [vmem:[%s4408_s8 + $0x44] sm:$0xf] }
 0x187   : > { %v3741_v23 = vld [vmem:[%s4408_s8 + $0x280] sm:$0xf]  ;;  %v4058_v24 = vld [vmem:[%s4408_s8 + $0x28c] sm:$0xf0]  ;;  %2342 = vmatpush.bf16.msra.mxu0 %v3502_v12  ;;  %v3614_v28 = vor.u32 %v4026_v22, %v3613_v20  ;;  %v3455_v47 = vld [vmem:[%s4408_s8 + $0x50] sm:$0xf0] }
 0x188   : > { %2355 = vmatpush.bf16.msra.mxu1 %v3630_v16  ;;  %v3742_v29 = vor.u32 %v4058_v24, %v3741_v23  ;;  %v3469_v31 = vld [vmem:[%s4408_s8 + $0x60] sm:$0xf]  ;;  %v3990_v32 = vld [vmem:[%s4408_s8 + $0x6c] sm:$0xf0]  ;;  %2381 = vmatpush.bf16.msra.mxu3 %v3506_v21  ;;  %v3458_v54 = vor.u32 %v3984_v46, %v3455_v47  ;;  %v3980_v59 = vld [vmem:[%s4408_s8 + $0x24] sm:$0xf] }
 0x189   : > { %2368 = vmatpush.bf16.msra.mxu2 %v3758_v17  ;;  %v3597_v33 = vld [vmem:[%s4408_s8 + $0x160] sm:$0xf]  ;;  %v4022_v35 = vld [vmem:[%s4408_s8 + $0x16c] sm:$0xf0]  ;;  %v3470_v39 = vor.u32 %v3990_v32, %v3469_v31  ;;  %v3439_v60 = vld [vmem:[%s4408_s8 + $0x30] sm:$0xf0] }
 0x18a   : > { %v3725_v55 = vld [vmem:[%s4408_s8 + $0x260] sm:$0xf]  ;;  %v4054_v36 = vld [vmem:[%s4408_s8 + $0x26c] sm:$0xf0]  ;;  %v3598_v6 = vor.u32 %v4022_v35, %v3597_v33  ;;  %v3442_v7 = vor.u32 %v3980_v59, %v3439_v60  ;;  %v3976_v30 = vld [vmem:[%s4408_s8 + $0x4] sm:$0xf] }
 0x18b   : > { %2343 = vmatpush.bf16.msra.mxu0 %v3486_v27  ;;  %v3726_v41 = vor.u32 %v4054_v36, %v3725_v55  ;;  %v3453_v26 = vld [vmem:[%s4408_s8 + $0x40] sm:$0xf]  ;;  %v3986_v42 = vld [vmem:[%s4408_s8 + $0x4c] sm:$0xf0]  ;;  %v3423_v9 = vld [vmem:[%s4408_s8 + $0x10] sm:$0xf0] }
 0x18c   : > { %2356 = vmatpush.bf16.msra.mxu1 %v3614_v28  ;;  %v3581_v40 = vld [vmem:[%s4408_s8 + $0x140] sm:$0xf]  ;;  %2382 = vmatpush.bf16.msra.mxu3 %v3490_v34  ;;  %v4018_v44 = vld [vmem:[%s4408_s8 + $0x14c] sm:$0xf0]  ;;  %v3454_v48 = vor.u32 %v3986_v42, %v3453_v26  ;;  %v4036_v11 = vld [vmem:[%s4408_s8 + $0x1e4] sm:$0xf]  ;;  %v3426_v23 = vor.u32 %v3976_v30, %v3423_v9 }
 0x18d   : > { %2369 = vmatpush.bf16.msra.mxu2 %v3742_v29  ;;  %v3709_v10 = vld [vmem:[%s4408_s8 + $0x240] sm:$0xf]  ;;  %v4050_v45 = vld [vmem:[%s4408_s8 + $0x24c] sm:$0xf0]  ;;  %v3582_v49 = vor.u32 %v4018_v44, %v3581_v40  ;;  %v3663_v12 = vld [vmem:[%s4408_s8 + $0x1f0] sm:$0xf0] }
 0x18e   : > { %v3710_v50 = vor.u32 %v4050_v45, %v3709_v10  ;;  %v3437_v51 = vld [vmem:[%s4408_s8 + $0x20] sm:$0xf]  ;;  %v3982_v52 = vld [vmem:[%s4408_s8 + $0x2c] sm:$0xf0]  ;;  %v4068_v13 = vld [vmem:[%s4408_s8 + $0x2e4] sm:$0xf]  ;;  %v3666_v24 = vor.u32 %v4036_v11, %v3663_v12 }
 0x18f   : > { %2344 = vmatpush.bf16.msra.mxu0 %v3470_v39  ;;  %v3565_v53 = vld [vmem:[%s4408_s8 + $0x120] sm:$0xf]  ;;  %v4014_v56 = vld [vmem:[%s4408_s8 + $0x12c] sm:$0xf0]  ;;  %v3438_v61 = vor.u32 %v3982_v52, %v3437_v51  ;;  %v3791_v15 = vld [vmem:[%s4408_s8 + $0x2f0] sm:$0xf0] }
 0x190   : > { %2357 = vmatpush.bf16.msra.mxu1 %v3598_v6  ;;  %2383 = vmatpush.bf16.msra.mxu3 %v3474_v43  ;;  %v3693_v57 = vld [vmem:[%s4408_s8 + $0x220] sm:$0xf]  ;;  %v4046_v58 = vld [vmem:[%s4408_s8 + $0x22c] sm:$0xf0]  ;;  %v3566_v1 = vor.u32 %v4014_v56, %v3565_v53  ;;  %v3541_v16 = vld [vmem:[%s4408_s8 + $0xe8] sm:$0xf]  ;;  %v3794_v27 = vor.u32 %v4068_v13, %v3791_v15 }
 0x191   : > { %2370 = vmatpush.bf16.msra.mxu2 %v3726_v41  ;;  %v3421_v62 = vld [vmem:[%s4408_s8] sm:$0xf]  ;;  %v3978_v63 = vld [vmem:[%s4408_s8 + $0xc] sm:$0xf0]  ;;  %v3694_v2 = vor.u32 %v4046_v58, %v3693_v57  ;;  %v4007_v17 = vld [vmem:[%s4408_s8 + $0xf4] sm:$0xf0] }
 0x192   : > { %v3549_v0 = vld [vmem:[%s4408_s8 + $0x100] sm:$0xf]  ;;  %v4010_v3 = vld [vmem:[%s4408_s8 + $0x10c] sm:$0xf0]  ;;  %v3422_v14 = vor.u32 %v3978_v63, %v3421_v62  ;;  %v3669_v20 = vld [vmem:[%s4408_s8 + $0x1e8] sm:$0xf]  ;;  %v3542_v28 = vor.u32 %v4007_v17, %v3541_v16 }
 0x193   : > { %2345 = vmatpush.bf16.msra.mxu0 %v3454_v48  ;;  %v3677_v4 = vld [vmem:[%s4408_s8 + $0x200] sm:$0xf]  ;;  %v4042_v8 = vld [vmem:[%s4408_s8 + $0x20c] sm:$0xf0]  ;;  %v3550_v18 = vor.u32 %v4010_v3, %v3549_v0  ;;  %v4039_v21 = vld [vmem:[%s4408_s8 + $0x1f4] sm:$0xf0] }
 0x194   : > { %2358 = vmatpush.bf16.msra.mxu1 %v3582_v49  ;;  %2384 = vmatpush.bf16.msra.mxu3 %v3458_v54  ;;  %v3678_v19 = vor.u32 %v4042_v8, %v3677_v4  ;;  %v1750_v22 = vld [vmem:[#allocation7 + $0x10] sm:$0xff]  ;;  %v1748_v5 = vld [vmem:[#allocation7] sm:$0xff]  ;;  %v1749_v25 = vld [vmem:[#allocation7 + $0x8] sm:$0xff]  ;;  %v3670_v33 = vor.u32 %v4039_v21, %v3669_v20  ;;  %p4095_p1 = scmp.eq.s32.totalorder %s4345_s25, 1  ;;  %s4290_s27 = smov [#allocation7]  }
 0x195   : > { %2371 = vmatpush.bf16.msra.mxu2 %v3710_v50  ;;  %v4032_v29 = vld [vmem:[%s4408_s8 + $0x1c4] sm:$0xf]  ;;  %v3647_v31 = vld [vmem:[%s4408_s8 + $0x1d0] sm:$0xf0]  ;;  %v4554_v34 = vpack.c.bf16 %v1750_v22, %v1750_v22  ;;  %v3525_v55 = vld [vmem:[%s4408_s8 + $0xc8] sm:$0xf]  ;;  %v4559_v37 = vpack.c.bf16 %v1748_v5, %v1748_v5  ;;  %v4563_v6 = vpack.c.bf16 %v1749_v25, %v1749_v25 }
 0x196   : > { %v4064_v32 = vld [vmem:[%s4408_s8 + $0x2c4] sm:$0xf]  ;;  %v3775_v35 = vld [vmem:[%s4408_s8 + $0x2d0] sm:$0xf0]  ;;  %v4003_v36 = vld [vmem:[%s4408_s8 + $0xd4] sm:$0xf0]  ;;  %v3650_v41 = vor.u32 %v4032_v29, %v3647_v31 }
 0x197   : > { %2346 = vmatpush.bf16.msra.mxu0 %v3438_v61  ;;  %v3653_v38 = vld [vmem:[%s4408_s8 + $0x1c8] sm:$0xf]  ;;  %v4035_v39 = vld [vmem:[%s4408_s8 + $0x1d4] sm:$0xf0]  ;;  %v3778_v26 = vor.u32 %v4064_v32, %v3775_v35  ;;  %v3526_v42 = vor.u32 %v4003_v36, %v3525_v55  ;;  %v4028_v40 = vld [vmem:[%s4408_s8 + $0x1a4] sm:$0xf] }
 0x198   : > { %2359 = vmatpush.bf16.msra.mxu1 %v3566_v1  ;;  %2385 = vmatpush.bf16.msra.mxu3 %v3442_v7  ;;  %v3631_v43 = vld [vmem:[%s4408_s8 + $0x1b0] sm:$0xf0]  ;;  %v4060_v44 = vld [vmem:[%s4408_s8 + $0x2a4] sm:$0xf]  ;;  %v3654_v10 = vor.u32 %v4035_v39, %v3653_v38  ;;  %v3509_v46 = vld [vmem:[%s4408_s8 + $0xa8] sm:$0xf] }
 0x199   : > { %2372 = vmatpush.bf16.msra.mxu2 %v3694_v2  ;;  %v3759_v45 = vld [vmem:[%s4408_s8 + $0x2b0] sm:$0xf0]  ;;  %v3999_v47 = vld [vmem:[%s4408_s8 + $0xb4] sm:$0xf0]  ;;  %v3637_v48 = vld [vmem:[%s4408_s8 + $0x1a8] sm:$0xf]  ;;  %v3634_v50 = vor.u32 %v4028_v40, %v3631_v43 }
 0x19a   : > { %v4031_v49 = vld [vmem:[%s4408_s8 + $0x1b4] sm:$0xf0]  ;;  %v3762_v51 = vor.u32 %v4060_v44, %v3759_v45  ;;  %v3510_v52 = vor.u32 %v3999_v47, %v3509_v46  ;;  %v4024_v53 = vld [vmem:[%s4408_s8 + $0x184] sm:$0xf]  ;;  %v3615_v54 = vld [vmem:[%s4408_s8 + $0x190] sm:$0xf0] }
 0x19b   : > { %2347 = vmatpush.bf16.msra.mxu0 %v3422_v14  ;;  %v4056_v56 = vld [vmem:[%s4408_s8 + $0x284] sm:$0xf]  ;;  %v3638_v57 = vor.u32 %v4031_v49, %v3637_v48  ;;  %v3743_v58 = vld [vmem:[%s4408_s8 + $0x290] sm:$0xf0]  ;;  %v3493_v59 = vld [vmem:[%s4408_s8 + $0x88] sm:$0xf]  ;;  %v3618_v63 = vor.u32 %v4024_v53, %v3615_v54 }
 0x19c   : > { %2360 = vmatpush.bf16.msra.mxu1 %v3550_v18  ;;  %2386 = vmatpush.bf16.msra.mxu3 %v3426_v23  ;;  %v3995_v60 = vld [vmem:[%s4408_s8 + $0x94] sm:$0xf0]  ;;  %v3621_v61 = vld [vmem:[%s4408_s8 + $0x188] sm:$0xf]  ;;  %v3746_v0 = vor.u32 %v4056_v56, %v3743_v58  ;;  %v4020_v2 = vld [vmem:[%s4408_s8 + $0x164] sm:$0xf] }
 0x19d   : > { %2373 = vmatpush.bf16.msra.mxu2 %v3678_v19  ;;  %v4027_v62 = vld [vmem:[%s4408_s8 + $0x194] sm:$0xf0]  ;;  %v3494_v1 = vor.u32 %v3995_v60, %v3493_v59  ;;  %v3599_v3 = vld [vmem:[%s4408_s8 + $0x170] sm:$0xf0]  ;;  %v4052_v4 = vld [vmem:[%s4408_s8 + $0x264] sm:$0xf] }
 0x19e   : > { %2348 = vmatmul.bf16.vlgmr.msra.gmra.mxu0 %v4559_v37  ;;  %v3622_v7 = vor.u32 %v4027_v62, %v3621_v61  ;;  %v3727_v8 = vld [vmem:[%s4408_s8 + $0x270] sm:$0xf0]  ;;  %v3477_v30 = vld [vmem:[%s4408_s8 + $0x68] sm:$0xf]  ;;  %v3991_v9 = vld [vmem:[%s4408_s8 + $0x74] sm:$0xf0]  ;;  %v3602_v13 = vor.u32 %v4020_v2, %v3599_v3 }
 0x19f   : > { %2392 = vmatpush.bf16.msrb.mxu0 %v3666_v24  ;;  %2361 = vmatmul.bf16.vlgmr.msra.gmra.mxu1 %v4563_v6  ;;  %v3605_v11 = vld [vmem:[%s4408_s8 + $0x168] sm:$0xf]  ;;  %v4023_v12 = vld [vmem:[%s4408_s8 + $0x174] sm:$0xf0]  ;;  %v3730_v14 = vor.u32 %v4052_v4, %v3727_v8  ;;  %v3478_v15 = vor.u32 %v3991_v9, %v3477_v30  ;;  %v4016_v16 = vld [vmem:[%s4408_s8 + $0x144] sm:$0xf] }
 0x1a0   : > { %2405 = vmatpush.bf16.msrb.mxu1 %v3794_v27  ;;  %2431 = vmatpush.bf16.msrb.mxu3 %v3670_v33  ;;  %v3583_v17 = vld [vmem:[%s4408_s8 + $0x150] sm:$0xf0]  ;;  %v4048_v18 = vld [vmem:[%s4408_s8 + $0x244] sm:$0xf]  ;;  %v3606_v19 = vor.u32 %v4023_v12, %v3605_v11  ;;  %v3461_v21 = vld [vmem:[%s4408_s8 + $0x48] sm:$0xf] }
 0x1a1   : > { %2418 = vmatpush.bf16.msrb.mxu2 %v3542_v28  ;;  %2387 = vmatmul.bf16.vlgmr.msra.gmra.mxu3 %v4559_v37  ;;  %v3711_v20 = vld [vmem:[%s4408_s8 + $0x250] sm:$0xf0]  ;;  %v3987_v22 = vld [vmem:[%s4408_s8 + $0x54] sm:$0xf0]  ;;  %v3589_v23 = vld [vmem:[%s4408_s8 + $0x148] sm:$0xf]  ;;  %v3586_v5 = vor.u32 %v4016_v16, %v3583_v17 }
 0x1a2   : > { %2374 = vmatmul.bf16.vlgmr.msra.gmra.mxu2 %v4554_v34  ;;  %v4019_v24 = vld [vmem:[%s4408_s8 + $0x154] sm:$0xf0]  ;;  %v3714_v25 = vor.u32 %v4048_v18, %v3711_v20  ;;  %v3462_v27 = vor.u32 %v3987_v22, %v3461_v21  ;;  %v4012_v28 = vld [vmem:[%s4408_s8 + $0x124] sm:$0xf]  ;;  %v3567_v29 = vld [vmem:[%s4408_s8 + $0x130] sm:$0xf0] }
 0x1a3   : > { %2393 = vmatpush.bf16.msrb.mxu0 %v3650_v41  ;;  %v4044_v31 = vld [vmem:[%s4408_s8 + $0x224] sm:$0xf]  ;;  %v3590_v32 = vor.u32 %v4019_v24, %v3589_v23  ;;  %v3695_v33 = vld [vmem:[%s4408_s8 + $0x230] sm:$0xf0]  ;;  %v3445_v35 = vld [vmem:[%s4408_s8 + $0x28] sm:$0xf]  ;;  %v3570_v39 = vor.u32 %v4012_v28, %v3567_v29 }
 0x1a4   : > { %2406 = vmatpush.bf16.msrb.mxu1 %v3778_v26  ;;  %2432 = vmatpush.bf16.msrb.mxu3 %v3654_v10  ;;  %v3983_v55 = vld [vmem:[%s4408_s8 + $0x34] sm:$0xf0]  ;;  %v3573_v36 = vld [vmem:[%s4408_s8 + $0x128] sm:$0xf]  ;;  %v4008_v41 = vld [vmem:[%s4408_s8 + $0x104] sm:$0xf] }
 0x1a5   : > { %2419 = vmatpush.bf16.msrb.mxu2 %v3526_v42  ;;  %v4015_v38 = vld [vmem:[%s4408_s8 + $0x134] sm:$0xf0]  ;;  %v3551_v26 = vld [vmem:[%s4408_s8 + $0x110] sm:$0xf0]  ;;  %v3698_v42 = vor.u32 %v4044_v31, %v3695_v33  ;;  %v3446_v40 = vor.u32 %v3983_v55, %v3445_v35  ;;  %v4040_v43 = vld [vmem:[%s4408_s8 + $0x204] sm:$0xf] }
 0x1a6   : > { %v3679_v44 = vld [vmem:[%s4408_s8 + $0x210] sm:$0xf0]  ;;  %v3429_v10 = vld [vmem:[%s4408_s8 + $0x8] sm:$0xf]  ;;  %v3574_v45 = vor.u32 %v4015_v38, %v3573_v36  ;;  %v3979_v46 = vld [vmem:[%s4408_s8 + $0x14] sm:$0xf0] }
 0x1a7   : > { %2394 = vmatpush.bf16.msrb.mxu0 %v3634_v50  ;;  %v3557_v47 = vld [vmem:[%s4408_s8 + $0x108] sm:$0xf]  ;;  %v4011_v48 = vld [vmem:[%s4408_s8 + $0x114] sm:$0xf0]  ;;  %v3543_v53 = vld [vmem:[%s4408_s8 + $0xf8] sm:$0xf0]  ;;  %v3430_v58 = vor.u32 %v3979_v46, %v3429_v10 }
 0x1a8   : > { %2407 = vmatpush.bf16.msrb.mxu1 %v3762_v51  ;;  %2433 = vmatpush.bf16.msrb.mxu3 %v3638_v57  ;;  %v3797_v49 = vld [vmem:[%s4408_s8 + $0x2e8] sm:$0xf]  ;;  %v4071_v50 = vld [vmem:[%s4408_s8 + $0x2f4] sm:$0xf0]  ;;  %v4005_v51 = vld [vmem:[%s4408_s8 + $0xec] sm:$0xf]  ;;  %v3682_v57 = vor.u32 %v4040_v43, %v3679_v44  ;;  %v3558_v61 = vor.u32 %v4011_v48, %v3557_v47 }
 0x1a9   : > { %2420 = vmatpush.bf16.msrb.mxu2 %v3510_v52  ;;  %v3554_v52 = vor.u32 %v4008_v41, %v3551_v26  ;;  %v4037_v54 = vld [vmem:[%s4408_s8 + $0x1ec] sm:$0xf]  ;;  %v3671_v56 = vld [vmem:[%s4408_s8 + $0x1f8] sm:$0xf0]  ;;  %v3798_v62 = vor.u32 %v4071_v50, %v3797_v49  ;;  %v4067_v2 = vld [vmem:[%s4408_s8 + $0x2d4] sm:$0xf0] }
 0x1aa   : > { %v4069_v59 = vld [vmem:[%s4408_s8 + $0x2ec] sm:$0xf]  ;;  %v3799_v60 = vld [vmem:[%s4408_s8 + $0x2f8] sm:$0xf0]  ;;  %v4063_v16 = vld [vmem:[%s4408_s8 + $0x2b4] sm:$0xf0] }
 0x1ab   : > { %2395 = vmatpush.bf16.msrb.mxu0 %v3618_v63  ;;  %v3546_v63 = vor.u32 %v4005_v51, %v3543_v53  ;;  %v4001_v3 = vld [vmem:[%s4408_s8 + $0xcc] sm:$0xf]  ;;  %v3802_v4 = vor.u32 %v4069_v59, %v3799_v60  ;;  %v3655_v30 = vld [vmem:[%s4408_s8 + $0x1d8] sm:$0xf0]  ;;  %v4059_v28 = vld [vmem:[%s4408_s8 + $0x294] sm:$0xf0] }
 0x1ac   : > { %2408 = vmatpush.bf16.msrb.mxu1 %v3746_v0  ;;  %2434 = vmatpush.bf16.msrb.mxu3 %v3622_v7  ;;  %v3674_v0 = vor.u32 %v4037_v54, %v3671_v56  ;;  %v3527_v7 = vld [vmem:[%s4408_s8 + $0xd8] sm:$0xf0]  ;;  %v4033_v8 = vld [vmem:[%s4408_s8 + $0x1cc] sm:$0xf]  ;;  %v3733_v26 = vld [vmem:[%s4408_s8 + $0x268] sm:$0xf] }
 0x1ad   : > { %2421 = vmatpush.bf16.msrb.mxu2 %v3494_v1  ;;  %v3781_v1 = vld [vmem:[%s4408_s8 + $0x2c8] sm:$0xf]  ;;  %v4065_v9 = vld [vmem:[%s4408_s8 + $0x2cc] sm:$0xf]  ;;  %v3783_v11 = vld [vmem:[%s4408_s8 + $0x2d8] sm:$0xf0] }
 0x1ae   : > { %v3782_v12 = vor.u32 %v4067_v2, %v3781_v1  ;;  %v3997_v17 = vld [vmem:[%s4408_s8 + $0xac] sm:$0xf]  ;;  %v3786_v18 = vor.u32 %v4065_v9, %v3783_v11  ;;  %v3639_v21 = vld [vmem:[%s4408_s8 + $0x1b8] sm:$0xf0]  ;;  %v3717_v51 = vld [vmem:[%s4408_s8 + $0x248] sm:$0xf] }
 0x1af   : > { %2396 = vmatpush.bf16.msrb.mxu0 %v3602_v13  ;;  %v3530_v13 = vor.u32 %v4001_v3, %v3527_v7  ;;  %v4029_v20 = vld [vmem:[%s4408_s8 + $0x1ac] sm:$0xf]  ;;  %v3767_v23 = vld [vmem:[%s4408_s8 + $0x2b8] sm:$0xf0]  ;;  %v4047_v1 = vld [vmem:[%s4408_s8 + $0x234] sm:$0xf0] }
 0x1b0   : > { %2409 = vmatpush.bf16.msrb.mxu1 %v3730_v14  ;;  %2435 = vmatpush.bf16.msrb.mxu3 %v3606_v19  ;;  %v3658_v14 = vor.u32 %v4033_v8, %v3655_v30  ;;  %v3511_v19 = vld [vmem:[%s4408_s8 + $0xb8] sm:$0xf0]  ;;  %v4061_v22 = vld [vmem:[%s4408_s8 + $0x2ac] sm:$0xf]  ;;  %s2631_s7 = sshll.u32 %s4290_s27, 4  ;;  %s2633_s26 = sshll.u32 %s4737_s5, 4  ;;  %s2632_s7 = int_to_ptr.vmem [resolvable:$true] %s2631_s7  ;;  %s2634_s26 = int_to_ptr.hbm [resolvable:$true] %s2633_s26 }
 0x1b1   : > { %2422 = vmatpush.bf16.msrb.mxu2 %v3478_v15  ;;  %v3765_v15 = vld [vmem:[%s4408_s8 + $0x2a8] sm:$0xf]  ;;  %v3993_v29 = vld [vmem:[%s4408_s8 + $0x8c] sm:$0xf]  ;;  %v3770_v31 = vor.u32 %v4061_v22, %v3767_v23  ;;  %v3623_v35 = vld [vmem:[%s4408_s8 + $0x198] sm:$0xf0] }
 0x1b2   : > { %v3766_v24 = vor.u32 %v4063_v16, %v3765_v15  ;;  %v4025_v33 = vld [vmem:[%s4408_s8 + $0x18c] sm:$0xf]  ;;  %v3751_v36 = vld [vmem:[%s4408_s8 + $0x298] sm:$0xf0]  ;;  %v4043_v15 = vld [vmem:[%s4408_s8 + $0x214] sm:$0xf0] }
 0x1b3   : > { %2397 = vmatpush.bf16.msrb.mxu0 %v3586_v5  ;;  %v3514_v5 = vor.u32 %v3997_v17, %v3511_v19  ;;  %v4057_v55 = vld [vmem:[%s4408_s8 + $0x28c] sm:$0xf]  ;;  %v3626_v41 = vor.u32 %v4025_v33, %v3623_v35  ;;  %v3479_v44 = vld [vmem:[%s4408_s8 + $0x78] sm:$0xf0]  ;;  %4081 = dma.vmem_to_hbm [thread:$0]  (%p4095_p1), %s2632_s7, 384, %s2634_s26, [#allocation4]  }
 0x1b4   : > { %2410 = vmatpush.bf16.msrb.mxu1 %v3714_v25  ;;  %2436 = vmatpush.bf16.msrb.mxu3 %v3590_v32  ;;  %v3642_v25 = vor.u32 %v4029_v20, %v3639_v21  ;;  %v3495_v32 = vld [vmem:[%s4408_s8 + $0x98] sm:$0xf0]  ;;  %v3754_v43 = vor.u32 %v4057_v55, %v3751_v36  ;;  %v4021_v10 = vld [vmem:[%s4408_s8 + $0x16c] sm:$0xf] }
 0x1b5   : > { %2423 = vmatpush.bf16.msrb.mxu2 %v3462_v27  ;;  %v3749_v27 = vld [vmem:[%s4408_s8 + $0x288] sm:$0xf]  ;;  %v4053_v46 = vld [vmem:[%s4408_s8 + $0x26c] sm:$0xf]  ;;  %v3735_v47 = vld [vmem:[%s4408_s8 + $0x278] sm:$0xf0] }
 0x1b6   : > { %v3750_v38 = vor.u32 %v4059_v28, %v3749_v27  ;;  %v3985_v53 = vld [vmem:[%s4408_s8 + $0x4c] sm:$0xf]  ;;  %v3738_v54 = vor.u32 %v4053_v46, %v3735_v47  ;;  %v3463_v56 = vld [vmem:[%s4408_s8 + $0x58] sm:$0xf0]  ;;  %v4694_v27 = vld [vmem:[%s303_s29] sm:$0xf] }
 0x1b7   : > { %2398 = vmatpush.bf16.msrb.mxu0 %v3570_v39  ;;  %v3498_v39 = vor.u32 %v3993_v29, %v3495_v32  ;;  %v4049_v59 = vld [vmem:[%s4408_s8 + $0x24c] sm:$0xf]  ;;  %v3719_v60 = vld [vmem:[%s4408_s8 + $0x258] sm:$0xf0]  ;;  %v1852_v28 = vperm.slane %v4694_v27, 0 }
 0x1b8   : > { %2411 = vmatpush.bf16.msrb.mxu1 %v3698_v42  ;;  %2437 = vmatpush.bf16.msrb.mxu3 %v3574_v45  ;;  %v4055_v42 = vld [vmem:[%s4408_s8 + $0x274] sm:$0xf0]  ;;  %v3607_v45 = vld [vmem:[%s4408_s8 + $0x178] sm:$0xf0]  ;;  %v3981_v2 = vld [vmem:[%s4408_s8 + $0x2c] sm:$0xf]  ;;  %v3722_v3 = vor.u32 %v4049_v59, %v3719_v60 }
 0x1b9   : > { %2424 = vmatpush.bf16.msrb.mxu2 %v3446_v40  ;;  %v3989_v40 = vld [vmem:[%s4408_s8 + $0x6c] sm:$0xf]  ;;  %v3734_v48 = vor.u32 %v4055_v42, %v3733_v26  ;;  %v3610_v50 = vor.u32 %v4021_v10, %v3607_v45  ;;  %v3575_v8 = vld [vmem:[%s4408_s8 + $0x138] sm:$0xf0]  ;;  %v1853_v45 = vperm.slane %v4694_v27, 1 }
 0x1ba   : > { %v3482_v49 = vor.u32 %v3989_v40, %v3479_v44  ;;  %v4013_v7 = vld [vmem:[%s4408_s8 + $0x12c] sm:$0xf]  ;;  %v3703_v9 = vld [vmem:[%s4408_s8 + $0x238] sm:$0xf0] }
 0x1bb   : > { %2399 = vmatpush.bf16.msrb.mxu0 %v3554_v52  ;;  %v4051_v52 = vld [vmem:[%s4408_s8 + $0x254] sm:$0xf0]  ;;  %v4045_v30 = vld [vmem:[%s4408_s8 + $0x22c] sm:$0xf]  ;;  %v3559_v20 = vld [vmem:[%s4408_s8 + $0x118] sm:$0xf0] }
 0x1bc   : > { %2412 = vmatpush.bf16.msrb.mxu1 %v3682_v57  ;;  %2438 = vmatpush.bf16.msrb.mxu3 %v3558_v61  ;;  %v4017_v57 = vld [vmem:[%s4408_s8 + $0x14c] sm:$0xf]  ;;  %v3718_v61 = vor.u32 %v4051_v52, %v3717_v51  ;;  %v3706_v17 = vor.u32 %v4045_v30, %v3703_v9  ;;  %v3687_v22 = vld [vmem:[%s4408_s8 + $0x218] sm:$0xf0] }
 0x1bd   : > { %2425 = vmatpush.bf16.msrb.mxu2 %v3430_v58  ;;  %v3591_v58 = vld [vmem:[%s4408_s8 + $0x158] sm:$0xf0]  ;;  %v3977_v16 = vld [vmem:[%s4408_s8 + $0xc] sm:$0xf] }
 0x1be   : > { %2400 = vmatmul.bf16.vlgmr.msrb.gmra.mxu0 %v4563_v6  ;;  %v4009_v19 = vld [vmem:[%s4408_s8 + $0x10c] sm:$0xf] }
 0x1bf   : > { %2444 = vmatpush.bf16.msra.mxu0 %v3798_v62  ;;  %2413 = vmatmul.bf16.vlgmr.msrb.gmra.mxu1 %v4554_v34  ;;  %v3466_v62 = vor.u32 %v3985_v53, %v3463_v56  ;;  %v4041_v21 = vld [vmem:[%s4408_s8 + $0x20c] sm:$0xf] }
 0x1c0   : > { %2457 = vmatpush.bf16.msra.mxu1 %v3546_v63  ;;  %2483 = vmatpush.bf16.msra.mxu3 %v3802_v4  ;;  %v3594_v63 = vor.u32 %v4017_v57, %v3591_v58  ;;  %v3447_v4 = vld [vmem:[%s4408_s8 + $0x38] sm:$0xf0] }
 0x1c1   : > { %2470 = vmatpush.bf16.msra.mxu2 %v3674_v0  ;;  %2439 = vmatmul.bf16.vlgmr.msrb.gmra.mxu3 %v4563_v6  ;;  %v3701_v0 = vld [vmem:[%s4408_s8 + $0x228] sm:$0xf] }
 0x1c2   : > { %2426 = vmatmul.bf16.vlgmr.msrb.gmra.mxu2 %v4559_v37  ;;  %v3702_v11 = vor.u32 %v4047_v1, %v3701_v0 }
 0x1c3   : > { %2445 = vmatpush.bf16.msra.mxu0 %v3782_v12  ;;  %v3450_v12 = vor.u32 %v3981_v2, %v3447_v4 }
 0x1c4   : > { %2458 = vmatpush.bf16.msra.mxu1 %v3530_v13  ;;  %2484 = vmatpush.bf16.msra.mxu3 %v3786_v18  ;;  %v3578_v13 = vor.u32 %v4013_v7, %v3575_v8  ;;  %v3431_v18 = vld [vmem:[%s4408_s8 + $0x18] sm:$0xf0] }
 0x1c5   : > { %2471 = vmatpush.bf16.msra.mxu2 %v3658_v14  ;;  %v3685_v14 = vld [vmem:[%s4408_s8 + $0x208] sm:$0xf] }
 0x1c6   : > { %v3686_v23 = vor.u32 %v4043_v15, %v3685_v14 }
 0x1c7   : > { %2446 = vmatpush.bf16.msra.mxu0 %v3766_v24  ;;  %v3434_v24 = vor.u32 %v3977_v16, %v3431_v18 }
 0x1c8   : > { %2459 = vmatpush.bf16.msra.mxu1 %v3514_v5  ;;  %2485 = vmatpush.bf16.msra.mxu3 %v3770_v31  ;;  %v3562_v5 = vor.u32 %v4009_v19, %v3559_v20 }
 0x1c9   : > { %2472 = vmatpush.bf16.msra.mxu2 %v3642_v25  ;;  %v3690_v25 = vor.u32 %v4041_v21, %v3687_v22 }
 0x1cb   : > { %2447 = vmatpush.bf16.msra.mxu0 %v3750_v38 }
 0x1cc   : > { %2460 = vmatpush.bf16.msra.mxu1 %v3498_v39  ;;  %2486 = vmatpush.bf16.msra.mxu3 %v3754_v43 }
 0x1cd   : > { %2473 = vmatpush.bf16.msra.mxu2 %v3626_v41 }
 0x1cf   : > { %2448 = vmatpush.bf16.msra.mxu0 %v3734_v48 }
 0x1d0   : > { %2461 = vmatpush.bf16.msra.mxu1 %v3482_v49  ;;  %2487 = vmatpush.bf16.msra.mxu3 %v3738_v54 }
 0x1d1   : > { %2474 = vmatpush.bf16.msra.mxu2 %v3610_v50 }
 0x1d3   : > { %2449 = vmatpush.bf16.msra.mxu0 %v3718_v61 }
 0x1d4   : > { %2462 = vmatpush.bf16.msra.mxu1 %v3466_v62  ;;  %2488 = vmatpush.bf16.msra.mxu3 %v3722_v3 }
 0x1d5   : > { %2475 = vmatpush.bf16.msra.mxu2 %v3594_v63 }
 0x1d7   : > { %2450 = vmatpush.bf16.msra.mxu0 %v3702_v11 }
 0x1d8   : > { %2463 = vmatpush.bf16.msra.mxu1 %v3450_v12  ;;  %2489 = vmatpush.bf16.msra.mxu3 %v3706_v17  ;;  %v1854_v12 = vperm.slane %v4694_v27, 2 }
 0x1d9   : > { %2476 = vmatpush.bf16.msra.mxu2 %v3578_v13 }
 0x1db   : > { %2451 = vmatpush.bf16.msra.mxu0 %v3686_v23 }
 0x1dc   : > { %2464 = vmatpush.bf16.msra.mxu1 %v3434_v24  ;;  %2490 = vmatpush.bf16.msra.mxu3 %v3690_v25  ;;  %v1855_v25 = vperm.slane %v4694_v27, 3 }
 0x1dd   : > { %2477 = vmatpush.bf16.msra.mxu2 %v3562_v5 }
 0x1de   : > { %2452 = vmatmul.bf16.vlgmr.msra.gmra.mxu0 %v4554_v34 }
 0x1df   : > { %2465 = vmatmul.bf16.vlgmr.msra.gmra.mxu1 %v4559_v37  ;;  %2491 = vmatmul.bf16.vlgmr.msra.gmra.mxu3 %v4554_v34 }
 0x1e0   : > { %2478 = vmatmul.bf16.vlgmr.msra.gmra.mxu2 %v4563_v6 }
 0x21b   : > { %v2349_v34 = vpop.f32.mrf.mxu0 }
 0x21c   : > { %v2362_v37 = vpop.f32.mrf.mxu1  ;;  %v2350_v6 = vadd.f32 %v2349_v34, %v1852_v28 }
 0x21e   : > { %v2363_v29 = vadd.f32 %v2362_v37, %v2350_v6 }
 0x223   : > { %v2351_v55 = vpop.f32.mrf.mxu0 }
 0x224   : > { %v2388_v33 = vpop.f32.mrf.mxu3  ;;  %v2364_v36 = vpop.f32.mrf.mxu1 }
 0x225   : > { %v2375_v31 = vpop.f32.mrf.mxu2  ;;  %v2389_v46 = vadd.f32 %v2388_v33, %v1853_v45 }
 0x226   : > { %v2376_v32 = vadd.f32 %v2375_v31, %v2363_v29 }
 0x228   : > { %v2496_v35 = vrot.slane %v2376_v32, 4 }
 0x22a   : > { %v2497_v38 = vmax.f32 %v2376_v32, %v2496_v35 }
 0x22c   : > { %v2498_v39 = vrot.slane %v2497_v38, 2  ;;  %v2390_v42 = vpop.f32.mrf.mxu3 }
 0x22d   : > { %v2377_v41 = vpop.f32.mrf.mxu2 }
 0x22e   : > { %v2499_v26 = vmax.f32 %v2497_v38, %v2498_v39 }
 0x230   : > { %v2500_v40 = vrot.slane %v2499_v26, 1 }
 0x232   : > { %v2501_v43 = vmax.f32 %v2499_v26, %v2500_v40 }
 0x234   : > { %v2520_v44 = vsub.f32 %v2376_v32, %v2501_v43 }
 0x236   : > { %v2524_v10 = vmul.f32 1.442695, %v2520_v44 }
 0x238   : > { %4136 = vpow2.f32 %v2524_v10 }
 0x23b   : > { %v2401_v47 = vpop.f32.mrf.mxu0 }
 0x23c   : > { %v2402_v49 = vadd.f32 %v2401_v47, %v2389_v46  ;;  %v2414_v50 = vpop.f32.mrf.mxu1 }
 0x23e   : > { %v4137_v48 = vpop.eup %4136  ;;  %v2415_v52 = vadd.f32 %v2414_v50, %v2402_v49 }
 0x23f   : > { %v2532_v51 = vrot.slane %v4137_v48, 4 }
 0x240   : > { %v2502_v54 = vrot.slane %v2415_v52, 4 }
 0x241   : > { %v2533_v53 = vadd.f32 %v4137_v48, %v2532_v51 }
 0x242   : > { %v2503_v57 = vmax.f32 %v2415_v52, %v2502_v54 }
 0x243   : > { %v2534_v56 = vrot.slane %v2533_v53, 2  ;;  %v2403_v61 = vpop.f32.mrf.mxu0 }
 0x244   : > { %v2440_v60 = vpop.f32.mrf.mxu3  ;;  %v2504_v62 = vrot.slane %v2503_v57, 2  ;;  %v2416_v63 = vpop.f32.mrf.mxu1 }
 0x245   : > { %v2427_v58 = vpop.f32.mrf.mxu2  ;;  %v2535_v59 = vadd.f32 %v2534_v56, %v2533_v53 }
 0x246   : > { %v2505_v1 = vmax.f32 %v2503_v57, %v2504_v62  ;;  %v2428_v16 = vadd.f32 %v2427_v58, %v1854_v12 }
 0x247   : > { %v2536_v0 = vrot.slane %v2535_v59, 1 }
 0x248   : > { %v2506_v3 = vrot.slane %v2505_v1, 1  ;;  %v2441_v23 = vadd.f32 %v2440_v60, %v2428_v16 }
 0x249   : > { %v2537_v2 = vadd.f32 %v2536_v0, %v2535_v59 }
 0x24a   : > { %v2507_v4 = vmax.f32 %v2505_v1, %v2506_v3 }
 0x24b   : > { %4138 = vrcp.f32 %v2537_v2  ;;  %v2567_v15 = vand.u32 2147483648, %v2537_v2  ;;  %vm2561_vm0 = vweird.f32 %v2537_v2  ;;  %v2565_v18 = vand.u32 2147483647, %v2537_v2 }
 0x24c   : > { %v2442_v8 = vpop.f32.mrf.mxu3  ;;  %v2521_v30 = vsub.f32 %v2415_v52, %v2507_v4 }
 0x24d   : > { %v2429_v7 = vpop.f32.mrf.mxu2  ;;  %v2568_v21 = vor.u32 1.1754944e-38, %v2567_v15  ;;  %vm2566_vm3 = vcmp.eq.f32.partialorder %v2565_v18, 8.507059e+37 }
 0x24e   : > { %v2526_v9 = vmul.f32 1.442695, %v2521_v30 }
 0x250   : > { %4140 = vpow2.f32 %v2526_v9 }
 0x251   : > { %v4139_v11 = vpop.eup %4138 }
 0x252   : > { %v2557_v13 = vmul.f32 %v4139_v11, %v2537_v2  ;;  %vm2562_vm1 = vweird.f32 %v4139_v11 }
 0x253   : > { %vm2563_vm2 = vmor %vm2561_vm0, %vm2562_vm1 }
 0x254   : > { %v2558_v14 = vsub.f32 1.0, %v2557_v13 }
 0x256   : > { %v2559_v17 = vmul.f32 %v4139_v11, %v2558_v14  ;;  %v4705_v19 = vpop.eup %4140 }
 0x257   : > { %v2538_v22 = vrot.slane %v4705_v19, 4 }
 0x258   : > { %v2560_v20 = vadd.f32 %v4139_v11, %v2559_v17 }
 0x259   : > { %v2539_v34 = vadd.f32 %v4705_v19, %v2538_v22 }
 0x25a   : > { %v2564_v24 = vsel %vm2563_vm2, %v4139_v11, %v2560_v20 }
 0x25b   : > { %v2453_v5 = vpop.f32.mrf.mxu0  ;;  %v2569_v28 = vsel %vm2566_vm3, %v2568_v21, %v2564_v24  ;;  %v2540_v31 = vrot.slane %v2539_v34, 2 }
 0x25c   : > { %v2454_v37 = vadd.f32 %v2453_v5, %v2441_v23  ;;  %v2466_v6 = vpop.f32.mrf.mxu1  ;;  %v2612_v29 = vmul.f32 %v4137_v48, %v2569_v28 }
 0x25d   : > { %v2467_v33 = vadd.f32 %v2466_v6, %v1855_v25  ;;  %v2541_v35 = vadd.f32 %v2540_v31, %v2539_v34 }
 0x25e   : > { %v2508_v32 = vrot.slane %v2454_v37, 4  ;;  %2616 = vst [vmem:[%s4425_s11] sm:$0xff] %v2612_v29 }
 0x25f   : > { %v2542_v36 = vrot.slane %v2541_v35, 1 }
 0x260   : > { %v2509_v55 = vmax.f32 %v2454_v37, %v2508_v32 }
 0x261   : > { %v2543_v40 = vadd.f32 %v2542_v36, %v2541_v35 }
 0x262   : > { %v2510_v38 = vrot.slane %v2509_v55, 2  ;;  %v2492_v26 = vpop.f32.mrf.mxu3 }
 0x263   : > { %v2479_v39 = vpop.f32.mrf.mxu2  ;;  %v2455_v42 = vpop.f32.mrf.mxu0  ;;  %4142 = vrcp.f32 %v2543_v40  ;;  %v2581_v59 = vand.u32 2147483648, %v2543_v40  ;;  %v2579_v61 = vand.u32 2147483647, %v2543_v40  ;;  %vm2575_vm5 = vweird.f32 %v2543_v40 }
 0x264   : > { %v2480_v41 = vadd.f32 %v2479_v39, %v2467_v33  ;;  %v2511_v27 = vmax.f32 %v2509_v55, %v2510_v38  ;;  %v2468_v43 = vpop.f32.mrf.mxu1 }
 0x265   : > { %v2582_v1 = vor.u32 1.1754944e-38, %v2581_v59  ;;  %vm2580_vm7 = vcmp.eq.f32.partialorder %v2579_v61, 8.507059e+37 }
 0x266   : > { %v2493_v44 = vadd.f32 %v2492_v26, %v2480_v41  ;;  %v2512_v10 = vrot.slane %v2511_v27, 1 }
 0x268   : > { %v2514_v45 = vrot.slane %v2493_v44, 4  ;;  %v2513_v46 = vmax.f32 %v2511_v27, %v2512_v10 }
 0x269   : > { %v4143_v52 = vpop.eup %4142 }
 0x26a   : > { %v2515_v47 = vmax.f32 %v2493_v44, %v2514_v45  ;;  %v2522_v49 = vsub.f32 %v2454_v37, %v2513_v46  ;;  %v2494_v51 = vpop.f32.mrf.mxu3  ;;  %v2571_v53 = vmul.f32 %v4143_v52, %v2543_v40  ;;  %vm2576_vm4 = vweird.f32 %v4143_v52 }
 0x26b   : > { %v2481_v48 = vpop.f32.mrf.mxu2  ;;  %vm2577_vm6 = vmor %vm2575_vm5, %vm2576_vm4 }
 0x26c   : > { %v2516_v50 = vrot.slane %v2515_v47, 2  ;;  %v2528_v54 = vmul.f32 1.442695, %v2522_v49  ;;  %v2572_v57 = vsub.f32 1.0, %v2571_v53 }
 0x26e   : > { %v2517_v56 = vmax.f32 %v2515_v47, %v2516_v50  ;;  %4144 = vpow2.f32 %v2528_v54  ;;  %v2573_v60 = vmul.f32 %v4143_v52, %v2572_v57 }
 0x270   : > { %v2518_v58 = vrot.slane %v2517_v56, 1  ;;  %v2574_v63 = vadd.f32 %v4143_v52, %v2573_v60 }
 0x272   : > { %v2519_v62 = vmax.f32 %v2517_v56, %v2518_v58  ;;  %v2578_v3 = vsel %vm2577_vm6, %v4143_v52, %v2574_v63 }
 0x273   : > { %v2583_v7 = vsel %vm2580_vm7, %v2582_v1, %v2578_v3 }
 0x274   : > { %v2523_v0 = vsub.f32 %v2493_v44, %v2519_v62  ;;  %v4145_v2 = vpop.eup %4144  ;;  %v2613_v30 = vmul.f32 %v4705_v19, %v2583_v7 }
 0x275   : > { %v2544_v8 = vrot.slane %v4145_v2, 4 }
 0x276   : > { %v2530_v4 = vmul.f32 1.442695, %v2523_v0  ;;  %2617 = vst [vmem:[%s4425_s11 + $0x8] sm:$0xff] %v2613_v30 }
 0x277   : > { %v2545_v9 = vadd.f32 %v4145_v2, %v2544_v8 }
 0x278   : > { %4146 = vpow2.f32 %v2530_v4 }
 0x279   : > { %v2546_v11 = vrot.slane %v2545_v9, 2 }
 0x27b   : > { %v2547_v12 = vadd.f32 %v2546_v11, %v2545_v9 }
 0x27d   : > { %v2548_v14 = vrot.slane %v2547_v12, 1 }
 0x27e   : > { %v4147_v13 = vpop.eup %4146 }
 0x27f   : > { %v2550_v15 = vrot.slane %v4147_v13, 4  ;;  %v2549_v16 = vadd.f32 %v2548_v14, %v2547_v12 }
 0x281   : > { %v2551_v17 = vadd.f32 %v4147_v13, %v2550_v15  ;;  %4148 = vrcp.f32 %v2549_v16  ;;  %v2595_v19 = vand.u32 2147483648, %v2549_v16  ;;  %v2593_v28 = vand.u32 2147483647, %v2549_v16 }
 0x282   : > { %vm2589_vm9 = vweird.f32 %v2549_v16 }
 0x283   : > { %v2552_v18 = vrot.slane %v2551_v17, 2  ;;  %v2596_v37 = vor.u32 1.1754944e-38, %v2595_v19  ;;  %vm2594_vm11 = vcmp.eq.f32.partialorder %v2593_v28, 8.507059e+37 }
 0x285   : > { %v2553_v20 = vadd.f32 %v2552_v18, %v2551_v17 }
 0x287   : > { %v2554_v21 = vrot.slane %v2553_v20, 1  ;;  %v4149_v22 = vpop.eup %4148 }
 0x288   : > { %v2585_v23 = vmul.f32 %v4149_v22, %v2549_v16  ;;  %vm2590_vm8 = vweird.f32 %v4149_v22 }
 0x289   : > { %v2555_v24 = vadd.f32 %v2554_v21, %v2553_v20  ;;  %vm2591_vm10 = vmor %vm2589_vm9, %vm2590_vm8 }
 0x28a   : > { %v2586_v5 = vsub.f32 1.0, %v2585_v23 }
 0x28b   : > { %4150 = vrcp.f32 %v2555_v24  ;;  %v2609_v55 = vand.u32 2147483648, %v2555_v24  ;;  %v2607_v38 = vand.u32 2147483647, %v2555_v24  ;;  %vm2603_vm13 = vweird.f32 %v2555_v24 }
 0x28c   : > { %v2587_v25 = vmul.f32 %v4149_v22, %v2586_v5 }
 0x28d   : > { %v2610_v41 = vor.u32 1.1754944e-38, %v2609_v55  ;;  %vm2608_vm15 = vcmp.eq.f32.partialorder %v2607_v38, 8.507059e+37 }
 0x28e   : > { %v2588_v34 = vadd.f32 %v4149_v22, %v2587_v25 }
 0x290   : > { %v2592_v29 = vsel %vm2591_vm10, %v4149_v22, %v2588_v34 }
 0x291   : > { %v4151_v6 = vpop.eup %4150  ;;  %v2597_v31 = vsel %vm2594_vm11, %v2596_v37, %v2592_v29 }
 0x292   : > { %v2599_v32 = vmul.f32 %v4151_v6, %v2555_v24  ;;  %v2614_v33 = vmul.f32 %v4145_v2, %v2597_v31  ;;  %vm2604_vm12 = vweird.f32 %v4151_v6 }
 0x293   : > { %vm2605_vm14 = vmor %vm2603_vm13, %vm2604_vm12 }
 0x294   : > { %v2600_v35 = vsub.f32 1.0, %v2599_v32  ;;  %2618 = vst [vmem:[%s4425_s11 + $0x10] sm:$0xff] %v2614_v33 }
 0x296   : > { %v2601_v36 = vmul.f32 %v4151_v6, %v2600_v35 }
 0x298   : > { %v2602_v39 = vadd.f32 %v4151_v6, %v2601_v36 }
 0x29a   : > { %v2606_v26 = vsel %vm2605_vm14, %v4151_v6, %v2602_v39 }
 0x29b   : > { %v2611_v42 = vsel %vm2608_vm15, %v2610_v41, %v2606_v26 }
 0x29c   : > { %v2615_v40 = vmul.f32 %v4147_v13, %v2611_v42 }
 0x29e   : > { %2619 = vst [vmem:[%s4425_s11 + $0x18] sm:$0xff] %v2615_v40 }
 0x29f   : > { %4265 = dma.done.wait (%p4095_p1), [#allocation4], 384  }
 0x2a0   : > { %4267 = vsyncadd (%p4095_p1), [#allocation4], 4294966912 }
 0x2a1 PF: > { %p19_p4 = scmp.ge.s32.totalorder %s4370_s9, 4   ;;  %s4742_s21 = smov %s4274_s22 }
 0x2a2   : > { %s4743_s22 = smov %s4278_s23  ;;  %s4744_s23 = smov %s4380_s14 }
 0x2a3   : > { %s4745_s24 = smov %s4370_s9  ;;  %21 = sbr.rel (!%p19_p4) target bundleno = 5 (0x5), region = 101 }
 0x2a8   :  { %2659 = vsyncpa [#allocation3], 1 }
 0x2a9   :  { %2661 = vsyncpa [#allocation3 + $0x1], 1 }
 0x2aa   :  { %2662 = vsyncpa [#allocation6], 1 }
 0x2ab   :  { %2664 = vsyncpa [#allocation6 + $0x1], 1 }
 0x2ac   :  { %2665 = vsyncpa [#allocation4], 1 }
 0x2ad   :  { %2667 = vsyncpa [#allocation4 + $0x1], 1 }

</bundles_post_ra>
